<compile_context>
chip_gen: v6e
topology: v6e:2x2x1
jax: 0.10.0
libtpu: 0.0.40
codegen_flags: <defaults>
</compile_context>

<pallas_src>
import jax
import jax.numpy as jnp
from jax.experimental import pallas as pl
from jax.experimental.pallas import tpu as pltpu

EPS = 1e-5


def _pch_kernel(src_ref, tgt_ref, we_ref, w1_ref, w2_ref, ep_ref, pp_ref, b2_ref,
                sf1_ref, sh_ref, tf1_ref, th_ref):
    B = src_ref.shape[0]

    # Fuse both branches into one M = 2B matmul pass; weights are read once.
    x = jnp.concatenate([src_ref[...], tgt_ref[...]], axis=0)        # (2B, dim1)

    ep = ep_ref[...]                                                  # (3, dim1): be, ge, bte
    be, ge, bte = ep[0:1], ep[1:2], ep[2:3]
    pp = pp_ref[...]                                                  # (3, hidden): b1, g1, bt1
    b1, g1, bt1 = pp[0:1], pp[1:2], pp[2:3]
    b2 = b2_ref[...]                                                  # (1, nbit)

    def bn_relu_per_branch(z, g, bt):
        # Training-mode BatchNorm (batch mean / biased variance) computed
        # independently for each 8-row branch half, then ReLU.
        def norm(zz):
            mu = jnp.mean(zz, axis=0, keepdims=True)
            d = zz - mu
            var = jnp.mean(d * d, axis=0, keepdims=True)
            scale = g * jax.lax.rsqrt(var + EPS)       # fold gamma into inv-std
            return jnp.maximum(d * scale + bt, 0.0)
        return jnp.concatenate([norm(z[:B]), norm(z[B:])], axis=0)

    # ---- encoder: Linear(dim1, dim1) -> BatchNorm1d(dim1) -> ReLU ----
    z = jnp.dot(x, we_ref[...], preferred_element_type=jnp.float32) + be
    f1 = bn_relu_per_branch(z, ge, bte)
    sf1_ref[...] = f1[:B]
    tf1_ref[...] = f1[B:]

    # ---- projector: Linear(dim1,1024) -> BN(1024) -> ReLU -> Linear(1024,nbit) -> Tanh ----
    # TODO(synk): optionally cast matmul operands to bf16 on v6e/v7x.
    p = jnp.dot(f1, w1_ref[...], preferred_element_type=jnp.float32) + b1
    pr = bn_relu_per_branch(p, g1, bt1)

    h = jnp.tanh(jnp.dot(pr, w2_ref[...], preferred_element_type=jnp.float32) + b2)
    sh_ref[...] = h[:B]
    th_ref[...] = h[B:]


def prepare_params(params):
    """Pack the small per-feature vectors ONCE, outside the per-call jitted path."""
    (we, be, ge, bte, w1, b1, g1, bt1, w2, b2) = params
    enc_par = jnp.concatenate([be, ge, bte], axis=0)       # (3, dim1)
    proj_par = jnp.concatenate([b1, g1, bt1], axis=0)      # (3, hidden)
    return (we, w1, w2, enc_par, proj_par, b2)


def pch_forward(source, target, packed):
    """Jitted forward: contains only the pallas_call (no host-side pad/pack)."""
    (we, w1, w2, enc_par, proj_par, b2) = packed
    B, dim1 = source.shape
    hidden = w1.shape[1]
    nbit = w2.shape[1]
    assert target.shape == (B, dim1) and B % 8 == 0

    vmem = pl.BlockSpec(memory_space=pltpu.MemorySpace.VMEM)
    sf1, sh, tf1, th = pl.pallas_call(
        _pch_kernel,
        out_shape=(jax.ShapeDtypeStruct((B, dim1), jnp.float32),
                   jax.ShapeDtypeStruct((B, nbit), jnp.float32),
                   jax.ShapeDtypeStruct((B, dim1), jnp.float32),
                   jax.ShapeDtypeStruct((B, nbit), jnp.float32)),
        in_specs=[vmem] * 8,
        out_specs=(vmem, vmem, vmem, vmem),
    )(source, target, we, w1, w2, enc_par, proj_par, b2)
    return sf1, sh, tf1, th


def init_params(key, dim1, nbit, hidden=1024):
    """Deterministic synthetic params with PyTorch-Linear-style uniform init."""
    k = jax.random.split(key, 6)

    def lin(kw, kb, fan_in, fan_out):
        bound = 1.0 / jnp.sqrt(fan_in)
        w = jax.random.uniform(kw, (fan_in, fan_out), jnp.float32, -bound, bound)
        b = jax.random.uniform(kb, (1, fan_out), jnp.float32, -bound, bound)
        return w, b

    we, be = lin(k[0], k[1], dim1, dim1)          # encoder Linear(dim1, dim1)
    w1, b1 = lin(k[2], k[3], dim1, hidden)        # projector Linear(dim1, 1024)
    w2, b2 = lin(k[4], k[5], hidden, nbit)        # projector Linear(1024, nbit)

    ge = jnp.ones((1, dim1), jnp.float32)         # BN(dim1) gamma
    bte = jnp.zeros((1, dim1), jnp.float32)       # BN(dim1) beta
    g1 = jnp.ones((1, hidden), jnp.float32)       # BN(1024) gamma
    bt1 = jnp.zeros((1, hidden), jnp.float32)     # BN(1024) beta

    return (we, be, ge, bte, w1, b1, g1, bt1, w2, b2)


def _reference(source, target, params):
    """Pure-JAX reference (training-mode BatchNorm) for sanity checking."""
    (we, be, ge, bte, w1, b1, g1, bt1, w2, b2) = params

    def bn(x, g, bt):
        mu = jnp.mean(x, axis=0, keepdims=True)
        var = jnp.mean((x - mu) ** 2, axis=0, keepdims=True)
        return (x - mu) / jnp.sqrt(var + EPS) * g + bt

    def branch(x):
        f1 = jax.nn.relu(bn(x @ we + be, ge, bte))
        p = jax.nn.relu(bn(f1 @ w1 + b1, g1, bt1))
        h = jnp.tanh(p @ w2 + b2)
        return f1, h

    sf1, sh = branch(source)
    tf1, th = branch(target)
    return sf1, sh, tf1, th


if __name__ == "__main__":
    B, DIM1, NBIT, HIDDEN = 8, 32, 16, 1024

    key = jax.random.PRNGKey(0)
    k_src, k_tgt, k_par = jax.random.split(key, 3)
    source = jax.random.normal(k_src, (B, DIM1), jnp.float32)
    target = jax.random.normal(k_tgt, (B, DIM1), jnp.float32)
    params = init_params(k_par, DIM1, NBIT, HIDDEN)

    # One-time packing at init, outside the per-call hot path.
    packed = jax.block_until_ready(prepare_params(params))

    fwd = jax.jit(pch_forward)
    outs = jax.block_until_ready(fwd(source, target, packed))

    refs = _reference(source, target, params)
    for o, r in zip(outs, refs):
        assert o.shape == r.shape and o.dtype == r.dtype
        assert float(jnp.max(jnp.abs(o - r))) < 1e-4, "mismatch vs reference"

    print("KERNEL_OK")
</pallas_src>

<mosaic_0001>
module attributes {stable_mosaic.version = 11 : i64} {
  func.func @_pch_kernel(%arg0: memref<8x32xf32, #tpu.memory_space<vmem>>, %arg1: memref<8x32xf32, #tpu.memory_space<vmem>>, %arg2: memref<32x32xf32, #tpu.memory_space<vmem>>, %arg3: memref<32x1024xf32, #tpu.memory_space<vmem>>, %arg4: memref<1024x16xf32, #tpu.memory_space<vmem>>, %arg5: memref<3x32xf32, #tpu.memory_space<vmem>>, %arg6: memref<3x1024xf32, #tpu.memory_space<vmem>>, %arg7: memref<1x16xf32, #tpu.memory_space<vmem>>, %arg8: memref<8x32xf32, #tpu.memory_space<vmem>>, %arg9: memref<8x16xf32, #tpu.memory_space<vmem>>, %arg10: memref<8x32xf32, #tpu.memory_space<vmem>>, %arg11: memref<8x16xf32, #tpu.memory_space<vmem>>) attributes {dimension_semantics = [], scalar_prefetch = 0 : i64, scratch_operands = 0 : i64, tpu.core_type = #tpu.core_type<tc>} {
    %c0 = arith.constant 0 : index
    %c0_0 = arith.constant 0 : index
    %0 = vector.load %arg0[%c0, %c0_0] : memref<8x32xf32, #tpu.memory_space<vmem>>, vector<8x32xf32>
    %c0_1 = arith.constant 0 : index
    %c0_2 = arith.constant 0 : index
    %1 = vector.load %arg1[%c0_1, %c0_2] : memref<8x32xf32, #tpu.memory_space<vmem>>, vector<8x32xf32>
    %2 = tpu.concatenate %0, %1 in 0 : vector<8x32xf32>, vector<8x32xf32> -> vector<16x32xf32>
    %c0_3 = arith.constant 0 : index
    %c0_4 = arith.constant 0 : index
    %3 = vector.load %arg5[%c0_3, %c0_4] : memref<3x32xf32, #tpu.memory_space<vmem>>, vector<3x32xf32>
    %4 = vector.extract_strided_slice %3 {offsets = [0, 0], sizes = [1, 32], strides = [1, 1]} : vector<3x32xf32> to vector<1x32xf32>
    %5 = vector.extract_strided_slice %3 {offsets = [1, 0], sizes = [1, 32], strides = [1, 1]} : vector<3x32xf32> to vector<1x32xf32>
    %6 = vector.extract_strided_slice %3 {offsets = [2, 0], sizes = [1, 32], strides = [1, 1]} : vector<3x32xf32> to vector<1x32xf32>
    %c0_5 = arith.constant 0 : index
    %c0_6 = arith.constant 0 : index
    %7 = vector.load %arg6[%c0_5, %c0_6] : memref<3x1024xf32, #tpu.memory_space<vmem>>, vector<3x1024xf32>
    %8 = vector.extract_strided_slice %7 {offsets = [0, 0], sizes = [1, 1024], strides = [1, 1]} : vector<3x1024xf32> to vector<1x1024xf32>
    %9 = vector.extract_strided_slice %7 {offsets = [1, 0], sizes = [1, 1024], strides = [1, 1]} : vector<3x1024xf32> to vector<1x1024xf32>
    %10 = vector.extract_strided_slice %7 {offsets = [2, 0], sizes = [1, 1024], strides = [1, 1]} : vector<3x1024xf32> to vector<1x1024xf32>
    %c0_7 = arith.constant 0 : index
    %c0_8 = arith.constant 0 : index
    %11 = vector.load %arg7[%c0_7, %c0_8] : memref<1x16xf32, #tpu.memory_space<vmem>>, vector<1x16xf32>
    %c0_9 = arith.constant 0 : index
    %c0_10 = arith.constant 0 : index
    %12 = vector.load %arg2[%c0_9, %c0_10] : memref<32x32xf32, #tpu.memory_space<vmem>>, vector<32x32xf32>
    %cst = arith.constant dense<0.000000e+00> : vector<16x32xf32>
    %13 = tpu.matmul %2, %12, %cst {dimension_numbers = #tpu.dot_dimension_numbers<[1], [0], [0], [1], [0, 0, 1, 1], [], []>} : vector<16x32xf32>, vector<32x32xf32>, vector<16x32xf32> -> vector<16x32xf32>
    %14 = vector.broadcast %4 : vector<1x32xf32> to vector<16x32xf32>
    %15 = arith.addf %13, %14 : vector<16x32xf32>
    %16 = vector.extract_strided_slice %15 {offsets = [0, 0], sizes = [8, 32], strides = [1, 1]} : vector<16x32xf32> to vector<8x32xf32>
    %cst_11 = arith.constant dense<0.000000e+00> : vector<32xf32>
    %17 = vector.multi_reduction <add>, %16, %cst_11 [0] : vector<8x32xf32> to vector<32xf32>
    %18 = vector.shape_cast %17 : vector<32xf32> to vector<1x32xf32>
    %cst_12 = arith.constant 8.000000e+00 : f32
    %19 = vector.broadcast %cst_12 : f32 to vector<1x32xf32>
    %20 = arith.divf %18, %19 : vector<1x32xf32>
    %21 = vector.broadcast %20 : vector<1x32xf32> to vector<8x32xf32>
    %22 = arith.subf %16, %21 : vector<8x32xf32>
    %23 = arith.mulf %22, %22 : vector<8x32xf32>
    %cst_13 = arith.constant dense<0.000000e+00> : vector<32xf32>
    %24 = vector.multi_reduction <add>, %23, %cst_13 [0] : vector<8x32xf32> to vector<32xf32>
    %25 = vector.shape_cast %24 : vector<32xf32> to vector<1x32xf32>
    %cst_14 = arith.constant 8.000000e+00 : f32
    %26 = vector.broadcast %cst_14 : f32 to vector<1x32xf32>
    %27 = arith.divf %25, %26 : vector<1x32xf32>
    %cst_15 = arith.constant 9.99999974E-6 : f32
    %28 = vector.broadcast %cst_15 : f32 to vector<1x32xf32>
    %29 = arith.addf %27, %28 : vector<1x32xf32>
    %30 = math.rsqrt %29 : vector<1x32xf32>
    %31 = arith.mulf %5, %30 : vector<1x32xf32>
    %32 = vector.broadcast %31 : vector<1x32xf32> to vector<8x32xf32>
    %33 = arith.mulf %22, %32 : vector<8x32xf32>
    %34 = vector.broadcast %6 : vector<1x32xf32> to vector<8x32xf32>
    %35 = arith.addf %33, %34 : vector<8x32xf32>
    %cst_16 = arith.constant 0.000000e+00 : f32
    %36 = vector.broadcast %cst_16 : f32 to vector<8x32xf32>
    %37 = arith.maximumf %35, %36 : vector<8x32xf32>
    %38 = vector.extract_strided_slice %15 {offsets = [8, 0], sizes = [8, 32], strides = [1, 1]} : vector<16x32xf32> to vector<8x32xf32>
    %cst_17 = arith.constant dense<0.000000e+00> : vector<32xf32>
    %39 = vector.multi_reduction <add>, %38, %cst_17 [0] : vector<8x32xf32> to vector<32xf32>
    %40 = vector.shape_cast %39 : vector<32xf32> to vector<1x32xf32>
    %cst_18 = arith.constant 8.000000e+00 : f32
    %41 = vector.broadcast %cst_18 : f32 to vector<1x32xf32>
    %42 = arith.divf %40, %41 : vector<1x32xf32>
    %43 = vector.broadcast %42 : vector<1x32xf32> to vector<8x32xf32>
    %44 = arith.subf %38, %43 : vector<8x32xf32>
    %45 = arith.mulf %44, %44 : vector<8x32xf32>
    %cst_19 = arith.constant dense<0.000000e+00> : vector<32xf32>
    %46 = vector.multi_reduction <add>, %45, %cst_19 [0] : vector<8x32xf32> to vector<32xf32>
    %47 = vector.shape_cast %46 : vector<32xf32> to vector<1x32xf32>
    %cst_20 = arith.constant 8.000000e+00 : f32
    %48 = vector.broadcast %cst_20 : f32 to vector<1x32xf32>
    %49 = arith.divf %47, %48 : vector<1x32xf32>
    %cst_21 = arith.constant 9.99999974E-6 : f32
    %50 = vector.broadcast %cst_21 : f32 to vector<1x32xf32>
    %51 = arith.addf %49, %50 : vector<1x32xf32>
    %52 = math.rsqrt %51 : vector<1x32xf32>
    %53 = arith.mulf %5, %52 : vector<1x32xf32>
    %54 = vector.broadcast %53 : vector<1x32xf32> to vector<8x32xf32>
    %55 = arith.mulf %44, %54 : vector<8x32xf32>
    %56 = vector.broadcast %6 : vector<1x32xf32> to vector<8x32xf32>
    %57 = arith.addf %55, %56 : vector<8x32xf32>
    %cst_22 = arith.constant 0.000000e+00 : f32
    %58 = vector.broadcast %cst_22 : f32 to vector<8x32xf32>
    %59 = arith.maximumf %57, %58 : vector<8x32xf32>
    %60 = tpu.concatenate %37, %59 in 0 : vector<8x32xf32>, vector<8x32xf32> -> vector<16x32xf32>
    %61 = vector.extract_strided_slice %60 {offsets = [0, 0], sizes = [8, 32], strides = [1, 1]} : vector<16x32xf32> to vector<8x32xf32>
    %c0_23 = arith.constant 0 : index
    %c0_24 = arith.constant 0 : index
    %62 = vector.load %arg8[%c0_23, %c0_24] : memref<8x32xf32, #tpu.memory_space<vmem>>, vector<8x32xf32>
    tpu.vector_store %arg8[%c0_23, %c0_24], %61 {strides = array<i32>} : memref<8x32xf32, #tpu.memory_space<vmem>>, vector<8x32xf32>,
    %63 = vector.extract_strided_slice %60 {offsets = [8, 0], sizes = [8, 32], strides = [1, 1]} : vector<16x32xf32> to vector<8x32xf32>
    %c0_25 = arith.constant 0 : index
    %c0_26 = arith.constant 0 : index
    %64 = vector.load %arg10[%c0_25, %c0_26] : memref<8x32xf32, #tpu.memory_space<vmem>>, vector<8x32xf32>
    tpu.vector_store %arg10[%c0_25, %c0_26], %63 {strides = array<i32>} : memref<8x32xf32, #tpu.memory_space<vmem>>, vector<8x32xf32>,
    %c0_27 = arith.constant 0 : index
    %c0_28 = arith.constant 0 : index
    %65 = vector.load %arg3[%c0_27, %c0_28] : memref<32x1024xf32, #tpu.memory_space<vmem>>, vector<32x1024xf32>
    %cst_29 = arith.constant dense<0.000000e+00> : vector<16x1024xf32>
    %66 = tpu.matmul %60, %65, %cst_29 {dimension_numbers = #tpu.dot_dimension_numbers<[1], [0], [0], [1], [0, 0, 1, 1], [], []>} : vector<16x32xf32>, vector<32x1024xf32>, vector<16x1024xf32> -> vector<16x1024xf32>
    %67 = vector.broadcast %8 : vector<1x1024xf32> to vector<16x1024xf32>
    %68 = arith.addf %66, %67 : vector<16x1024xf32>
    %69 = vector.extract_strided_slice %68 {offsets = [0, 0], sizes = [8, 1024], strides = [1, 1]} : vector<16x1024xf32> to vector<8x1024xf32>
    %cst_30 = arith.constant dense<0.000000e+00> : vector<1024xf32>
    %70 = vector.multi_reduction <add>, %69, %cst_30 [0] : vector<8x1024xf32> to vector<1024xf32>
    %71 = vector.shape_cast %70 : vector<1024xf32> to vector<1x1024xf32>
    %cst_31 = arith.constant 8.000000e+00 : f32
    %72 = vector.broadcast %cst_31 : f32 to vector<1x1024xf32>
    %73 = arith.divf %71, %72 : vector<1x1024xf32>
    %74 = vector.broadcast %73 : vector<1x1024xf32> to vector<8x1024xf32>
    %75 = arith.subf %69, %74 : vector<8x1024xf32>
    %76 = arith.mulf %75, %75 : vector<8x1024xf32>
    %cst_32 = arith.constant dense<0.000000e+00> : vector<1024xf32>
    %77 = vector.multi_reduction <add>, %76, %cst_32 [0] : vector<8x1024xf32> to vector<1024xf32>
    %78 = vector.shape_cast %77 : vector<1024xf32> to vector<1x1024xf32>
    %cst_33 = arith.constant 8.000000e+00 : f32
    %79 = vector.broadcast %cst_33 : f32 to vector<1x1024xf32>
    %80 = arith.divf %78, %79 : vector<1x1024xf32>
    %cst_34 = arith.constant 9.99999974E-6 : f32
    %81 = vector.broadcast %cst_34 : f32 to vector<1x1024xf32>
    %82 = arith.addf %80, %81 : vector<1x1024xf32>
    %83 = math.rsqrt %82 : vector<1x1024xf32>
    %84 = arith.mulf %9, %83 : vector<1x1024xf32>
    %85 = vector.broadcast %84 : vector<1x1024xf32> to vector<8x1024xf32>
    %86 = arith.mulf %75, %85 : vector<8x1024xf32>
    %87 = vector.broadcast %10 : vector<1x1024xf32> to vector<8x1024xf32>
    %88 = arith.addf %86, %87 : vector<8x1024xf32>
    %cst_35 = arith.constant 0.000000e+00 : f32
    %89 = vector.broadcast %cst_35 : f32 to vector<8x1024xf32>
    %90 = arith.maximumf %88, %89 : vector<8x1024xf32>
    %91 = vector.extract_strided_slice %68 {offsets = [8, 0], sizes = [8, 1024], strides = [1, 1]} : vector<16x1024xf32> to vector<8x1024xf32>
    %cst_36 = arith.constant dense<0.000000e+00> : vector<1024xf32>
    %92 = vector.multi_reduction <add>, %91, %cst_36 [0] : vector<8x1024xf32> to vector<1024xf32>
    %93 = vector.shape_cast %92 : vector<1024xf32> to vector<1x1024xf32>
    %cst_37 = arith.constant 8.000000e+00 : f32
    %94 = vector.broadcast %cst_37 : f32 to vector<1x1024xf32>
    %95 = arith.divf %93, %94 : vector<1x1024xf32>
    %96 = vector.broadcast %95 : vector<1x1024xf32> to vector<8x1024xf32>
    %97 = arith.subf %91, %96 : vector<8x1024xf32>
    %98 = arith.mulf %97, %97 : vector<8x1024xf32>
    %cst_38 = arith.constant dense<0.000000e+00> : vector<1024xf32>
    %99 = vector.multi_reduction <add>, %98, %cst_38 [0] : vector<8x1024xf32> to vector<1024xf32>
    %100 = vector.shape_cast %99 : vector<1024xf32> to vector<1x1024xf32>
    %cst_39 = arith.constant 8.000000e+00 : f32
    %101 = vector.broadcast %cst_39 : f32 to vector<1x1024xf32>
    %102 = arith.divf %100, %101 : vector<1x1024xf32>
    %cst_40 = arith.constant 9.99999974E-6 : f32
    %103 = vector.broadcast %cst_40 : f32 to vector<1x1024xf32>
    %104 = arith.addf %102, %103 : vector<1x1024xf32>
    %105 = math.rsqrt %104 : vector<1x1024xf32>
    %106 = arith.mulf %9, %105 : vector<1x1024xf32>
    %107 = vector.broadcast %106 : vector<1x1024xf32> to vector<8x1024xf32>
    %108 = arith.mulf %97, %107 : vector<8x1024xf32>
    %109 = vector.broadcast %10 : vector<1x1024xf32> to vector<8x1024xf32>
    %110 = arith.addf %108, %109 : vector<8x1024xf32>
    %cst_41 = arith.constant 0.000000e+00 : f32
    %111 = vector.broadcast %cst_41 : f32 to vector<8x1024xf32>
    %112 = arith.maximumf %110, %111 : vector<8x1024xf32>
    %113 = tpu.concatenate %90, %112 in 0 : vector<8x1024xf32>, vector<8x1024xf32> -> vector<16x1024xf32>
    %c0_42 = arith.constant 0 : index
    %c0_43 = arith.constant 0 : index
    %114 = vector.load %arg4[%c0_42, %c0_43] : memref<1024x16xf32, #tpu.memory_space<vmem>>, vector<1024x16xf32>
    %cst_44 = arith.constant dense<0.000000e+00> : vector<16x16xf32>
    %115 = tpu.matmul %113, %114, %cst_44 {dimension_numbers = #tpu.dot_dimension_numbers<[1], [0], [0], [1], [0, 0, 1, 1], [], []>} : vector<16x1024xf32>, vector<1024x16xf32>, vector<16x16xf32> -> vector<16x16xf32>
    %116 = vector.broadcast %11 : vector<1x16xf32> to vector<16x16xf32>
    %117 = arith.addf %115, %116 : vector<16x16xf32>
    %118 = math.tanh %117 : vector<16x16xf32>
    %119 = vector.extract_strided_slice %118 {offsets = [0, 0], sizes = [8, 16], strides = [1, 1]} : vector<16x16xf32> to vector<8x16xf32>
    %c0_45 = arith.constant 0 : index
    %c0_46 = arith.constant 0 : index
    %120 = vector.load %arg9[%c0_45, %c0_46] : memref<8x16xf32, #tpu.memory_space<vmem>>, vector<8x16xf32>
    tpu.vector_store %arg9[%c0_45, %c0_46], %119 {strides = array<i32>} : memref<8x16xf32, #tpu.memory_space<vmem>>, vector<8x16xf32>,
    %121 = vector.extract_strided_slice %118 {offsets = [8, 0], sizes = [8, 16], strides = [1, 1]} : vector<16x16xf32> to vector<8x16xf32>
    %c0_47 = arith.constant 0 : index
    %c0_48 = arith.constant 0 : index
    %122 = vector.load %arg11[%c0_47, %c0_48] : memref<8x16xf32, #tpu.memory_space<vmem>>, vector<8x16xf32>
    tpu.vector_store %arg11[%c0_47, %c0_48], %121 {strides = array<i32>} : memref<8x16xf32, #tpu.memory_space<vmem>>, vector<8x16xf32>,
    return
  }
}

</mosaic_0001>

<bundles_post_ra>
// kernel: pch_forward.1
= control target key start
LH: loop header
LB: loop body
LE: loop exit
PB: predicated region body
PF: predicated region fallthrough
CT: control target
= control target key end

     0   :  { %17 = vsyncpa [#allocation3], 0  ;;  %s3009_s0 = inlined_call_operand.vmem [shape: f32[8,32], index: 0, kind: input, shape index: {}]   ;;  %s3010_s1 = inlined_call_operand.vmem [shape: f32[8,32], index: 1, kind: input, shape index: {}]   ;;  %s3011_s2 = inlined_call_operand.vmem [shape: f32[32,32], index: 2, kind: input, shape index: {}]   ;;  %s3012_s3 = inlined_call_operand.vmem [shape: f32[32,1024], index: 3, kind: input, shape index: {}]   ;;  %s3013_s4 = inlined_call_operand.vmem [shape: f32[1024,16], index: 4, kind: input, shape index: {}]   ;;  %s3014_s5 = inlined_call_operand.vmem [shape: f32[3,32], index: 5, kind: input, shape index: {}]   ;;  %s3015_s6 = inlined_call_operand.vmem [shape: f32[3,1024], index: 6, kind: input, shape index: {}]   ;;  %s3016_s7 = inlined_call_operand.vmem [shape: f32[1,16], index: 7, kind: input, shape index: {}]   ;;  %s3017_s8 = inlined_call_operand.hbm [shape: f32[8,32], index: 8, kind: output, shape index: {0}]   ;;  %s3018_s9 = inlined_call_operand.hbm [shape: f32[8,16], index: 9, kind: output, shape index: {1}]   ;;  %s3019_s10 = inlined_call_operand.hbm [shape: f32[8,32], index: 10, kind: output, shape index: {2}]   ;;  %s3020_s11 = inlined_call_operand.hbm [shape: f32[8,16], index: 11, kind: output, shape index: {3}]  }
   0x1   :  { %18 = vsyncpa [#allocation5], 0  ;;  %v47_v0 = vld [vmem:[%s3011_s2 + $0x18] sm:$0xff]  ;;  %v46_v1 = vld [vmem:[%s3011_s2 + $0x10] sm:$0xff]  ;;  %vm52_vm0 = vcmask 261120  }
   0x2   :  { %1890 = vmatprep.subr.mxu0 %v47_v0  ;;  %v36_v2 = vld [vmem:[%s3009_s0] sm:$0xff]  ;;  %v45_v3 = vld [vmem:[%s3011_s2 + $0x8] sm:$0xff] }
   0x3   :  { %1891 = vmatpush3.msra.mxu0 %v47_v0  ;;  %1898 = vmatprep.mubr.msk.f32.mxu0 %vm52_vm0, %v36_v2 }
   0x4   :  { %19 = vsyncpa [#allocation8], 0  ;;  %1892 = vmatprep.subr.mxu0 %v46_v1  ;;  %v44_v4 = vld [vmem:[%s3011_s2] sm:$0xff]  ;;  %v222_v6 = vld [vmem:[%s3012_s3 + $0xc8] sm:$0xff]  ;;  %v2034_v22 = vmov 0.0   ;;  %v48_v25 = vlaneseq }
   0x5   :  { %1893 = vmatpush3.msra.mxu0 %v46_v1  ;;  %v37_v5 = vld [vmem:[%s3010_s1] sm:$0xff]  ;;  %v224_v7 = vld [vmem:[%s3012_s3 + $0xd8] sm:$0xff]  ;;  %335 = vmatprep.subr.mxu1 %v222_v6  ;;  %v223_v9 = vld [vmem:[%s3012_s3 + $0xd0] sm:$0xff] }
   0x6   :  { %1894 = vmatprep.subr.mxu0 %v45_v3  ;;  %v221_v8 = vld [vmem:[%s3012_s3 + $0xc0] sm:$0xff]  ;;  %v214_v10 = vld [vmem:[%s3012_s3 + $0x88] sm:$0xff]  ;;  %v216_v11 = vld [vmem:[%s3012_s3 + $0x98] sm:$0xff]  ;;  %375 = vmatprep.mubr.f32.mxu1 %v2034_v22  ;;  %v2175_v26 = vshrl.u32 %v48_v25, 7 }
   0x7   :  { %1895 = vmatpush3.msra.mxu0 %v45_v3  ;;  %336 = vmatpush1.msra.mxu1 %v221_v8  ;;  %v213_v12 = vld [vmem:[%s3012_s3 + $0x80] sm:$0xff]  ;;  %v215_v13 = vld [vmem:[%s3012_s3 + $0x90] sm:$0xff]  ;;  %v206_v14 = vld [vmem:[%s3012_s3 + $0x48] sm:$0xff] }
   0x8   :  { %1896 = vmatprep.subr.mxu0 %v44_v4  ;;  %337 = vmatprep.subr.mxu1 %v214_v10  ;;  %v208_v15 = vld [vmem:[%s3012_s3 + $0x58] sm:$0xff]  ;;  %v205_v16 = vld [vmem:[%s3012_s3 + $0x40] sm:$0xff]  ;;  %v207_v17 = vld [vmem:[%s3012_s3 + $0x50] sm:$0xff]  ;;  %v2178_v27 = vsub.s32 0, %v2175_v26  ;;  %v2189_v8 = vsub.s32 1, %v2175_v26 }
   0x9   :  { %1897 = vmatpush3.msra.mxu0 %v44_v4  ;;  %338 = vmatpush1.msra.mxu1 %v213_v12  ;;  %v198_v18 = vld [vmem:[%s3012_s3 + $0x8] sm:$0xff]  ;;  %v200_v19 = vld [vmem:[%s3012_s3 + $0x18] sm:$0xff]  ;;  %v197_v20 = vld [vmem:[%s3012_s3] sm:$0xff] }
   0xa   :  { %1899 = vmatmul.mubr.msk.f32.vlgmr.msra.gmra.mxu0 %vm52_vm0, %v37_v5  ;;  %412 = vmatprep.subr.mxu0 %v224_v7  ;;  %v199_v21 = vld [vmem:[%s3012_s3 + $0x10] sm:$0xff]  ;;  %v226_v23 = vld [vmem:[%s3012_s3 + $0xe8] sm:$0xff]  ;;  %v228_v24 = vld [vmem:[%s3012_s3 + $0xf8] sm:$0xff] }
   0xb   :  { %413 = vmatpush1.msra.mxu0 %v223_v9  ;;  %339 = vmatprep.subr.mxu1 %v206_v14  ;;  %v38_v28 = vld [vmem:[%s3014_s5] sm:$0x7]  ;;  %v2192_v9 = vsub.s32 2, %v2175_v26  ;;  %v227_v25 = vld [vmem:[%s3012_s3 + $0xf0] sm:$0xff] }
   0xc   :  { %414 = vmatprep.subr.mxu0 %v216_v11  ;;  %340 = vmatpush1.msra.mxu1 %v205_v16  ;;  %v51_v29 = vrot.slane %v38_v28, %v2178_v27 }
   0xd   :  { %415 = vmatpush1.msra.mxu0 %v215_v13  ;;  %341 = vmatprep.subr.mxu1 %v198_v18  ;;  %v164_v13 = vrot.slane %v38_v28, %v2192_v9 }
   0xe   :  { %416 = vmatprep.subr.mxu0 %v208_v15  ;;  %342 = vmatpush1.msra.mxu1 %v197_v20 }
   0xf   :  { %417 = vmatpush1.msra.mxu0 %v207_v17  ;;  %452 = vmatprep.mubr.f32.mxu0 %v2034_v22 }
  0x10   :  { %418 = vmatprep.subr.mxu0 %v200_v19  ;;  %489 = vmatprep.subr.mxu1 %v226_v23 }
  0x11   :  { %419 = vmatpush1.msra.mxu0 %v199_v21 }
  0x12   :  { %566 = vmatprep.subr.mxu0 %v228_v24  ;;  %v225_v24 = vld [vmem:[%s3012_s3 + $0xe0] sm:$0xff] }
  0xca   :  { %v1900_v30 = vpop.f32.mrf.mxu0 }
  0xcb   :  { %v131_v31 = vadd.f32 %v1900_v30, %v51_v29  ;;  %v217_v30 = vld [vmem:[%s3012_s3 + $0xa0] sm:$0xff] }
  0xcc   :  { %v125_v32 = vpop.f32.mrf.mxu0 }
  0xcd   :  { %v167_v33 = vsel %vm52_vm0, %v131_v31, 0.0  ;;  %v126_v34 = vadd.f32 %v125_v32, %v51_v29  ;;  %v220_v29 = vld [vmem:[%s3012_s3 + $0xb8] sm:$0xff]  ;;  %v210_v32 = vld [vmem:[%s3012_s3 + $0x68] sm:$0xff] }
  0xce   :  { %v168_v35 = vrot.slane %v167_v33, 4 }
  0xcf   :  { %v134_v36 = vsel %vm52_vm0, %v126_v34, 0.0 }
  0xd0   :  { %v169_v37 = vadd.f32 %v168_v35, %v167_v33  ;;  %v135_v38 = vrot.slane %v134_v36, 4  ;;  %v212_v33 = vld [vmem:[%s3012_s3 + $0x78] sm:$0xff]  ;;  %v211_v35 = vld [vmem:[%s3012_s3 + $0x70] sm:$0xff] }
  0xd2   :  { %v170_v39 = vrot.slane %v169_v37, 2  ;;  %v136_v40 = vadd.f32 %v135_v38, %v134_v36  ;;  %v202_v36 = vld [vmem:[%s3012_s3 + $0x28] sm:$0xff]  ;;  %v201_v38 = vld [vmem:[%s3012_s3 + $0x20] sm:$0xff] }
  0xd4   :  { %v171_v41 = vadd.f32 %v170_v39, %v169_v37  ;;  %v137_v42 = vrot.slane %v136_v40, 2  ;;  %v204_v37 = vld [vmem:[%s3012_s3 + $0x38] sm:$0xff]  ;;  %v203_v39 = vld [vmem:[%s3012_s3 + $0x30] sm:$0xff] }
  0xd6   :  { %v172_v43 = vrot.slane %v171_v41, 1  ;;  %v138_v44 = vadd.f32 %v137_v42, %v136_v40  ;;  %v1258_v40 = vld [vmem:[%s3013_s4 + $0xf8] sm:$0xff] }
  0xd7   :  { %v1242_v42 = vld [vmem:[%s3013_s4 + $0x78] sm:$0xff] }
  0xd8   :  { %v173_v45 = vadd.f32 %v172_v43, %v171_v41  ;;  %v139_v46 = vrot.slane %v138_v44, 1  ;;  %v1290_v41 = vld [vmem:[%s3013_s4 + $0x1f8] sm:$0xff]  ;;  %v1257_v43 = vld [vmem:[%s3013_s4 + $0xf0] sm:$0xff] }
  0xda   :  { %v174_v47 = vmul.f32 0.125, %v173_v45  ;;  %v140_v48 = vadd.f32 %v139_v46, %v138_v44  ;;  %v1289_v44 = vld [vmem:[%s3013_s4 + $0x1f0] sm:$0xff] }
  0xdb   :  { %v1241_v45 = vld [vmem:[%s3013_s4 + $0x70] sm:$0xff] }
  0xdc   :  { %v175_v49 = vsub.f32 %v131_v31, %v174_v47  ;;  %v142_v50 = vmul.f32 0.125, %v140_v48  ;;  %v219_v31 = vld [vmem:[%s3012_s3 + $0xb0] sm:$0xff]  ;;  %v1256_v47 = vld [vmem:[%s3013_s4 + $0xe8] sm:$0xff] }
  0xdd   :  { %v1273_v46 = vld [vmem:[%s3013_s4 + $0x170] sm:$0xff]  ;;  %v1288_v48 = vld [vmem:[%s3013_s4 + $0x1e8] sm:$0xff] }
  0xde   :  { %v176_v51 = vmul.f32 %v175_v49, %v175_v49  ;;  %v143_v52 = vsub.f32 %v126_v34, %v142_v50  ;;  %v209_v34 = vld [vmem:[%s3012_s3 + $0x60] sm:$0xff]  ;;  %v1272_v50 = vld [vmem:[%s3013_s4 + $0x168] sm:$0xff] }
  0xe0   :  { %v177_v53 = vsel %vm52_vm0, %v176_v51, 0.0  ;;  %v144_v54 = vmul.f32 %v143_v52, %v143_v52  ;;  %v1255_v51 = vld [vmem:[%s3013_s4 + $0xe0] sm:$0xff] }
  0xe1   :  { %v178_v55 = vrot.slane %v177_v53, 4 }
  0xe2   :  { %v145_v56 = vsel %vm52_vm0, %v144_v54, 0.0  ;;  %v1271_v54 = vld [vmem:[%s3013_s4 + $0x160] sm:$0xff] }
  0xe3   :  { %v179_v57 = vadd.f32 %v178_v55, %v177_v53  ;;  %v146_v58 = vrot.slane %v145_v56, 4  ;;  %v1239_v53 = vld [vmem:[%s3013_s4 + $0x60] sm:$0xff]  ;;  %v1254_v55 = vld [vmem:[%s3013_s4 + $0xd8] sm:$0xff] }
  0xe5   :  { %v180_v59 = vrot.slane %v179_v57, 2  ;;  %v147_v60 = vadd.f32 %v146_v58, %v145_v56  ;;  %v1286_v56 = vld [vmem:[%s3013_s4 + $0x1d8] sm:$0xff] }
  0xe6   :  { %v1270_v58 = vld [vmem:[%s3013_s4 + $0x158] sm:$0xff] }
  0xe7   :  { %v181_v61 = vadd.f32 %v180_v59, %v179_v57  ;;  %v148_v62 = vrot.slane %v147_v60, 2  ;;  %v1238_v57 = vld [vmem:[%s3013_s4 + $0x58] sm:$0xff]  ;;  %v1253_v59 = vld [vmem:[%s3013_s4 + $0xd0] sm:$0xff] }
  0xe9   :  { %v182_v63 = vrot.slane %v181_v61, 1  ;;  %v149_v0 = vadd.f32 %v148_v62, %v147_v60  ;;  %v1285_v60 = vld [vmem:[%s3013_s4 + $0x1d0] sm:$0xff] }
  0xea   :  { %v1269_v62 = vld [vmem:[%s3013_s4 + $0x150] sm:$0xff] }
  0xeb   :  { %v183_v1 = vadd.f32 %v182_v63, %v181_v61  ;;  %v150_v2 = vrot.slane %v149_v0, 1  ;;  %v1237_v61 = vld [vmem:[%s3013_s4 + $0x50] sm:$0xff]  ;;  %v1252_v63 = vld [vmem:[%s3013_s4 + $0xc8] sm:$0xff] }
  0xed   :  { %v184_v3 = vmul.f32 0.125, %v183_v1  ;;  %v151_v4 = vadd.f32 %v150_v2, %v149_v0  ;;  %v1284_v0 = vld [vmem:[%s3013_s4 + $0x1c8] sm:$0xff] }
  0xee   :  { %v1236_v1 = vld [vmem:[%s3013_s4 + $0x48] sm:$0xff] }
  0xef   :  { %v185_v5 = vadd.f32 1e-05, %v184_v3  ;;  %v152_v6 = vmul.f32 0.125, %v151_v4  ;;  %v1268_v2 = vld [vmem:[%s3013_s4 + $0x148] sm:$0xff]  ;;  %v1251_v3 = vld [vmem:[%s3013_s4 + $0xc0] sm:$0xff] }
  0xf0   :  { %v1283_v4 = vld [vmem:[%s3013_s4 + $0x1c0] sm:$0xff] }
  0xf1   :  { %1906 = vrsqrt.f32 %v185_v5  ;;  %v153_v7 = vadd.f32 1e-05, %v152_v6  ;;  %v1235_v5 = vld [vmem:[%s3013_s4 + $0x40] sm:$0xff] }
  0xf2   :  { %v1267_v6 = vld [vmem:[%s3013_s4 + $0x140] sm:$0xff] }
  0xf3   :  { %1908 = vrsqrt.f32 %v153_v7  ;;  %v1250_v7 = vld [vmem:[%s3013_s4 + $0xb8] sm:$0xff] }
  0xfe   :  { %v1907_v10 = vpop.eup %1906 }
  0xff   :  { %v187_v11 = vmul.f32 %v1907_v10, %v38_v28  ;;  %v1282_v10 = vld [vmem:[%s3013_s4 + $0x1b8] sm:$0xff] }
 0x100   :  { %v1909_v12 = vpop.eup %1908 }
 0x101   :  { %v191_v14 = vrot.slane %v187_v11, %v2189_v8  ;;  %v155_v15 = vmul.f32 %v1909_v12, %v38_v28  ;;  %v218_v28 = vld [vmem:[%s3012_s3 + $0xa8] sm:$0xff]  ;;  %v1234_v11 = vld [vmem:[%s3013_s4 + $0x38] sm:$0xff] }
 0x102   :  { %v1266_v12 = vld [vmem:[%s3013_s4 + $0x138] sm:$0xff] }
 0x103   :  { %v192_v16 = vmul.f32 %v191_v14, %v175_v49  ;;  %v159_v17 = vrot.slane %v155_v15, %v2189_v8  ;;  %v1240_v49 = vld [vmem:[%s3013_s4 + $0x68] sm:$0xff]  ;;  %v1281_v14 = vld [vmem:[%s3013_s4 + $0x1b0] sm:$0xff] }
 0x104   :  { %v1233_v15 = vld [vmem:[%s3013_s4 + $0x30] sm:$0xff] }
 0x105   :  { %v193_v18 = vadd.f32 %v192_v16, %v164_v13  ;;  %v160_v19 = vmul.f32 %v159_v17, %v143_v52  ;;  %v1287_v52 = vld [vmem:[%s3013_s4 + $0x1e0] sm:$0xff]  ;;  %v1265_v16 = vld [vmem:[%s3013_s4 + $0x130] sm:$0xff]  ;;  %v1248_v17 = vld [vmem:[%s3013_s4 + $0xa8] sm:$0xff] }
 0x107   :  { %v194_v20 = vmax.f32 %v193_v18, 0.0  ;;  %v165_v21 = vadd.f32 %v164_v13, %v160_v19  ;;  %v1249_v13 = vld [vmem:[%s3013_s4 + $0xb0] sm:$0xff]  ;;  %v1280_v18 = vld [vmem:[%s3013_s4 + $0x1a8] sm:$0xff] }
 0x108   :  { %v1232_v19 = vld [vmem:[%s3013_s4 + $0x28] sm:$0xff] }
 0x109   :  { %196 = vst.msk [vmem:[#allocation6] sm:$0xff] %vm52_vm0, %v194_v20  ;;  %v166_v23 = vmax.f32 %v165_v21, 0.0  ;;  %v1247_v21 = vld [vmem:[%s3013_s4 + $0xa0] sm:$0xff] }
 0x10b   :  { %195 = vst.msk [vmem:[#allocation2] sm:$0xff] %vm52_vm0, %v166_v23  ;;  %1723 = vmatmul.mubr.msk.f32.vlgmr.msra.gmra.mxu1 %vm52_vm0, %v166_v23  ;;  %1725 = vmatmul.mubr.msk.f32.vlgmr.msra.gmra.mxu0 %vm52_vm0, %v166_v23 }
 0x10c   :  { %490 = vmatpush1.msra.mxu1 %v225_v24  ;;  %567 = vmatpush1.msra.mxu0 %v227_v25  ;;  %v1231_v24 = vld [vmem:[%s3013_s4 + $0x20] sm:$0xff] }
 0x10d   :  { %491 = vmatprep.subr.mxu1 %v218_v28  ;;  %568 = vmatprep.subr.mxu0 %v220_v29  ;;  %v1263_v25 = vld [vmem:[%s3013_s4 + $0x120] sm:$0xff]  ;;  %v1246_v28 = vld [vmem:[%s3013_s4 + $0x98] sm:$0xff] }
 0x10e   :  { %381 = vmatprep.mubr.f32.mxu1 %v2034_v22  ;;  %458 = vmatprep.mubr.f32.mxu0 %v2034_v22  ;;  %v1278_v29 = vld [vmem:[%s3013_s4 + $0x198] sm:$0xff] }
 0x10f   :  { %492 = vmatpush1.msra.mxu1 %v217_v30  ;;  %569 = vmatpush1.msra.mxu0 %v219_v31  ;;  %v1230_v30 = vld [vmem:[%s3013_s4 + $0x18] sm:$0xff] }
 0x110   :  { %1724 = vmatmul.mubr.msk.f32.gmra.mxu1 %vm52_vm0, %v194_v20  ;;  %1726 = vmatmul.mubr.msk.f32.gmra.mxu0 %vm52_vm0, %v194_v20  ;;  %v1262_v31 = vld [vmem:[%s3013_s4 + $0x118] sm:$0xff] }
 0x111   :  { %493 = vmatprep.subr.mxu1 %v210_v32  ;;  %570 = vmatprep.subr.mxu0 %v212_v33  ;;  %v1245_v32 = vld [vmem:[%s3013_s4 + $0x90] sm:$0xff] }
 0x112   :  { %494 = vmatpush1.msra.mxu1 %v209_v34  ;;  %571 = vmatpush1.msra.mxu0 %v211_v35  ;;  %v1277_v33 = vld [vmem:[%s3013_s4 + $0x190] sm:$0xff] }
 0x113   :  { %495 = vmatprep.subr.mxu1 %v202_v36  ;;  %572 = vmatprep.subr.mxu0 %v204_v37  ;;  %v1229_v34 = vld [vmem:[%s3013_s4 + $0x10] sm:$0xff]  ;;  %v1244_v36 = vld [vmem:[%s3013_s4 + $0x88] sm:$0xff] }
 0x114   :  { %496 = vmatpush1.msra.mxu1 %v201_v38  ;;  %529 = vmatprep.mubr.f32.mxu1 %v2034_v22  ;;  %v1261_v35 = vld [vmem:[%s3013_s4 + $0x110] sm:$0xff]  ;;  %v1276_v37 = vld [vmem:[%s3013_s4 + $0x188] sm:$0xff] }
 0x115   :  { %573 = vmatpush1.msra.mxu0 %v203_v39  ;;  %606 = vmatprep.mubr.f32.mxu0 %v2034_v22  ;;  %v1228_v38 = vld [vmem:[%s3013_s4 + $0x8] sm:$0xff] }
 0x116   :  { %1727 = vmatmul.mubr.msk.f32.vlgmr.msra.gmra.mxu1 %vm52_vm0, %v166_v23  ;;  %1729 = vmatmul.mubr.msk.f32.vlgmr.msra.gmra.mxu0 %vm52_vm0, %v166_v23  ;;  %v1279_v23 = vld [vmem:[%s3013_s4 + $0x1a0] sm:$0xff]  ;;  %v1260_v39 = vld [vmem:[%s3013_s4 + $0x108] sm:$0xff] }
 0x117   :  { %535 = vmatprep.mubr.f32.mxu1 %v2034_v22  ;;  %612 = vmatprep.mubr.f32.mxu0 %v2034_v22  ;;  %v1274_v22 = vld [vmem:[%s3013_s4 + $0x178] sm:$0xff] }
 0x118   :  { %1738 = vmatprep.subr.mxu1 %v1258_v40  ;;  %1776 = vmatprep.subr.mxu0 %v1290_v41  ;;  %v1243_v40 = vld [vmem:[%s3013_s4 + $0x80] sm:$0xff] }
 0x119   :  { %1739 = vmatpush3.msra.mxu1 %v1242_v42  ;;  %1777 = vmatpush3.msra.mxu0 %v1274_v22  ;;  %v1275_v41 = vld [vmem:[%s3013_s4 + $0x180] sm:$0xff] }
 0x11a   :  { %1728 = vmatmul.mubr.msk.f32.gmra.mxu1 %vm52_vm0, %v194_v20  ;;  %1730 = vmatmul.mubr.msk.f32.gmra.mxu0 %vm52_vm0, %v194_v20  ;;  %v1264_v20 = vld [vmem:[%s3013_s4 + $0x128] sm:$0xff]  ;;  %v1227_v42 = vld [vmem:[%s3013_s4] sm:$0xff] }
 0x11b   :  { %1740 = vmatprep.subr.mxu1 %v1257_v43  ;;  %1778 = vmatprep.subr.mxu0 %v1289_v44  ;;  %v1259_v22 = vld [vmem:[%s3013_s4 + $0x100] sm:$0xff]  ;;  %v1322_v43 = vld [vmem:[%s3013_s4 + $0x2f8] sm:$0xff] }
 0x11c   :  { %1741 = vmatpush3.msra.mxu1 %v1241_v45  ;;  %1779 = vmatpush3.msra.mxu0 %v1273_v46  ;;  %v1354_v44 = vld [vmem:[%s3013_s4 + $0x3f8] sm:$0xff]  ;;  %v2456_v45 = vld [vmem:[%s3015_s6] sm:$0x77]  ;;  %v2461_v46 = vld [vmem:[%s3015_s6 + $0x8] sm:$0x77] }
 0x11d   :  { %1742 = vmatprep.subr.mxu1 %v1256_v47  ;;  %1780 = vmatprep.subr.mxu0 %v1288_v48  ;;  %v239_v47 = vsub.s32 4, %v2175_v26  ;;  %v236_v48 = vrot.slane %v2456_v45, %v2178_v27 }
 0x11e   :  { %1743 = vmatpush3.msra.mxu1 %v1240_v49  ;;  %1781 = vmatpush3.msra.mxu0 %v1272_v50  ;;  %v244_v49 = vrot.slane %v2461_v46, %v2178_v27 }
 0x11f   :  { %1744 = vmatprep.subr.mxu1 %v1255_v51  ;;  %1782 = vmatprep.subr.mxu0 %v1287_v52  ;;  %v240_v50 = vrot.slane %v2456_v45, %v239_v47  ;;  %v248_v51 = vrot.slane %v2461_v46, %v239_v47  ;;  %v2473_v52 = vld [vmem:[%s3015_s6 + $0x10] sm:$0x77] }
 0x120   :  { %1745 = vmatpush3.msra.mxu1 %v1239_v53  ;;  %1783 = vmatpush3.msra.mxu0 %v1271_v54  ;;  %v2478_v53 = vld [vmem:[%s3015_s6 + $0x18] sm:$0x77]  ;;  %v2481_v54 = vsub.s32 6, %v2175_v26 }
 0x121   :  { %1746 = vmatprep.subr.mxu1 %v1254_v55  ;;  %1784 = vmatprep.subr.mxu0 %v1286_v56  ;;  %v276_v55 = vrot.slane %v236_v48, %v2178_v27  ;;  %v284_v56 = vrot.slane %v244_v49, %v2178_v27 }
 0x122   :  { %1747 = vmatpush3.msra.mxu1 %v1238_v57  ;;  %1785 = vmatpush3.msra.mxu0 %v1270_v58  ;;  %v252_v57 = vrot.slane %v2473_v52, %v2178_v27  ;;  %v260_v58 = vrot.slane %v2478_v53, %v2178_v27 }
 0x123   :  { %1748 = vmatprep.subr.mxu1 %v1253_v59  ;;  %1786 = vmatprep.subr.mxu0 %v1285_v60  ;;  %v256_v59 = vrot.slane %v2473_v52, %v239_v47  ;;  %v280_v60 = vrot.slane %v240_v50, %v2178_v27 }
 0x124   :  { %1749 = vmatpush3.msra.mxu1 %v1237_v61  ;;  %1787 = vmatpush3.msra.mxu0 %v1269_v62  ;;  %v288_v61 = vrot.slane %v248_v51, %v2178_v27 }
 0x125   :  { %1750 = vmatprep.subr.mxu1 %v1252_v63  ;;  %1788 = vmatprep.subr.mxu0 %v1284_v0  ;;  %v264_v0 = vrot.slane %v2478_v53, %v239_v47 }
 0x126   :  { %1751 = vmatpush3.msra.mxu1 %v1236_v1  ;;  %1789 = vmatpush3.msra.mxu0 %v1268_v2  ;;  %v878_v1 = vrot.slane %v2456_v45, %v2481_v54  ;;  %v886_v2 = vrot.slane %v2461_v46, %v2481_v54 }
 0x127   :  { %1752 = vmatprep.subr.mxu1 %v1251_v3  ;;  %1790 = vmatprep.subr.mxu0 %v1283_v4 }
 0x128   :  { %1753 = vmatpush3.msra.mxu1 %v1235_v5  ;;  %1791 = vmatpush3.msra.mxu0 %v1267_v6 }
 0x129   :  { %1754 = vmatprep.subr.mxu1 %v1250_v7  ;;  %1792 = vmatprep.subr.mxu0 %v1282_v10  ;;  %v2502_v7 = vrot.slane %v252_v57, %v2178_v27  ;;  %v2505_v10 = vrot.slane %v260_v58, %v2178_v27 }
 0x12a   :  { %1755 = vmatpush3.msra.mxu1 %v1234_v11  ;;  %1793 = vmatpush3.msra.mxu0 %v1266_v12  ;;  %v2508_v11 = vrot.slane %v256_v59, %v2178_v27 }
 0x12b   :  { %1756 = vmatprep.subr.mxu1 %v1249_v13  ;;  %1794 = vmatprep.subr.mxu0 %v1281_v14 }
 0x12c   :  { %1757 = vmatpush3.msra.mxu1 %v1233_v15  ;;  %1795 = vmatpush3.msra.mxu0 %v1265_v16  ;;  %v2517_v16 = vrot.slane %v264_v0, %v2178_v27 }
 0x12d   :  { %1758 = vmatprep.subr.mxu1 %v1248_v17  ;;  %1796 = vmatprep.subr.mxu0 %v1280_v18  ;;  %v2520_v17 = vsub.s32 5, %v2175_v26  ;;  %v2523_v18 = vrot.slane %v878_v1, %v2192_v9 }
 0x12e   :  { %1759 = vmatpush3.msra.mxu1 %v1232_v19  ;;  %1797 = vmatpush3.msra.mxu0 %v1264_v20  ;;  %v2526_v19 = vrot.slane %v886_v2, %v2192_v9 }
 0x12f   :  { %1760 = vmatprep.subr.mxu1 %v1247_v21  ;;  %1798 = vmatprep.subr.mxu0 %v1279_v23 }
 0x130   :  { %1761 = vmatpush3.msra.mxu1 %v1231_v24  ;;  %1799 = vmatpush3.msra.mxu0 %v1263_v25 }
 0x131   :  { %1762 = vmatprep.subr.mxu1 %v1246_v28  ;;  %1800 = vmatprep.subr.mxu0 %v1278_v29 }
 0x132   :  { %1763 = vmatpush3.msra.mxu1 %v1230_v30  ;;  %1801 = vmatpush3.msra.mxu0 %v1262_v31 }
 0x133   :  { %1764 = vmatprep.subr.mxu1 %v1245_v32  ;;  %1802 = vmatprep.subr.mxu0 %v1277_v33 }
 0x134   :  { %1765 = vmatpush3.msra.mxu1 %v1229_v34  ;;  %1803 = vmatpush3.msra.mxu0 %v1261_v35 }
 0x135   :  { %1766 = vmatprep.subr.mxu1 %v1244_v36  ;;  %1804 = vmatprep.subr.mxu0 %v1276_v37 }
 0x136   :  { %1767 = vmatpush3.msra.mxu1 %v1228_v38  ;;  %1805 = vmatpush3.msra.mxu0 %v1260_v39 }
 0x137   :  { %1768 = vmatprep.subr.mxu1 %v1243_v40  ;;  %1806 = vmatprep.subr.mxu0 %v1275_v41 }
 0x138   :  { %1769 = vmatpush3.msra.mxu1 %v1227_v42  ;;  %1807 = vmatpush3.msra.mxu0 %v1259_v22 }
 0x139   :  { %1814 = vmatprep.subr.mxu1 %v1322_v43  ;;  %1852 = vmatprep.subr.mxu0 %v1354_v44 }
 0x1cb   :  { %v377_v62 = vpop.f32.mrf.mxu1  ;;  %v454_v63 = vpop.f32.mrf.mxu0 }
 0x1cc   :  { %v2497_v3 = vadd.f32 %v377_v62, %v276_v55  ;;  %v2499_v4 = vadd.f32 %v454_v63, %v284_v56 }
 0x1cd   :  { %v379_v5 = vpop.f32.mrf.mxu1  ;;  %v456_v6 = vpop.f32.mrf.mxu0 }
 0x1ce   :  { %v619_v12 = vrot.slane %v2497_v3, 4  ;;  %v631_v13 = vrot.slane %v2499_v4, 4  ;;  %v2512_v14 = vadd.f32 %v379_v5, %v280_v60  ;;  %v2514_v15 = vadd.f32 %v456_v6, %v288_v61 }
 0x1d0   :  { %v620_v20 = vadd.f32 %v619_v12, %v2497_v3  ;;  %v632_v21 = vadd.f32 %v631_v13, %v2499_v4  ;;  %v625_v23 = vrot.slane %v2512_v14, 4  ;;  %v637_v24 = vrot.slane %v2514_v15, 4  ;;  %v383_v25 = vpop.f32.mrf.mxu1  ;;  %v460_v27 = vpop.f32.mrf.mxu0 }
 0x1d1   :  { %v2532_v28 = vadd.f32 %v383_v25, %v276_v55  ;;  %v2534_v26 = vadd.f32 %v460_v27, %v284_v56 }
 0x1d2   :  { %v621_v31 = vrot.slane %v620_v20, 2  ;;  %v633_v32 = vrot.slane %v632_v21, 2  ;;  %v626_v33 = vadd.f32 %v625_v23, %v2512_v14  ;;  %v638_v34 = vadd.f32 %v637_v24, %v2514_v15  ;;  %v385_v35 = vpop.f32.mrf.mxu1  ;;  %v462_v36 = vpop.f32.mrf.mxu0 }
 0x1d3   :  { %v959_v37 = vrot.slane %v2532_v28, 4  ;;  %v971_v38 = vrot.slane %v2534_v26, 4  ;;  %v2544_v39 = vadd.f32 %v385_v35, %v280_v60  ;;  %v2546_v40 = vadd.f32 %v462_v36, %v288_v61 }
 0x1d4   :  { %v622_v41 = vadd.f32 %v621_v31, %v620_v20  ;;  %v634_v42 = vadd.f32 %v633_v32, %v632_v21  ;;  %v627_v22 = vrot.slane %v626_v33, 2  ;;  %v639_v43 = vrot.slane %v638_v34, 2 }
 0x1d5   :  { %v960_v44 = vadd.f32 %v959_v37, %v2532_v28  ;;  %v972_v47 = vadd.f32 %v971_v38, %v2534_v26  ;;  %v965_v48 = vrot.slane %v2544_v39, 4  ;;  %v977_v49 = vrot.slane %v2546_v40, 4 }
 0x1d6   :  { %v623_v50 = vrot.slane %v622_v41, 1  ;;  %v635_v51 = vrot.slane %v634_v42, 1  ;;  %v628_v55 = vadd.f32 %v627_v22, %v626_v33  ;;  %v640_v56 = vadd.f32 %v639_v43, %v638_v34 }
 0x1d7   :  { %v961_v57 = vrot.slane %v960_v44, 2  ;;  %v973_v58 = vrot.slane %v972_v47, 2  ;;  %v966_v59 = vadd.f32 %v965_v48, %v2544_v39  ;;  %v978_v60 = vadd.f32 %v977_v49, %v2546_v40 }
 0x1d8   :  { %v624_v61 = vadd.f32 %v623_v50, %v622_v41  ;;  %v636_v62 = vadd.f32 %v635_v51, %v634_v42  ;;  %v629_v63 = vrot.slane %v628_v55, 1  ;;  %v641_v0 = vrot.slane %v640_v56, 1 }
 0x1d9   :  { %v962_v1 = vadd.f32 %v961_v57, %v960_v44  ;;  %v974_v2 = vadd.f32 %v973_v58, %v972_v47  ;;  %v967_v5 = vrot.slane %v966_v59, 2  ;;  %v979_v6 = vrot.slane %v978_v60, 2 }
 0x1da   :  { %v667_v12 = vmul.f32 0.125, %v624_v61  ;;  %v669_v13 = vmul.f32 0.125, %v636_v62  ;;  %v630_v20 = vadd.f32 %v629_v63, %v628_v55  ;;  %v642_v21 = vadd.f32 %v641_v0, %v640_v56 }
 0x1db   :  { %v963_v23 = vrot.slane %v962_v1, 1  ;;  %v975_v24 = vrot.slane %v974_v2, 1  ;;  %v968_v25 = vadd.f32 %v967_v5, %v966_v59  ;;  %v980_v27 = vadd.f32 %v979_v6, %v978_v60 }
 0x1dc   :  { %v2555_v31 = vsub.f32 %v2497_v3, %v667_v12  ;;  %v2558_v32 = vsub.f32 %v2499_v4, %v669_v13  ;;  %v668_v33 = vmul.f32 0.125, %v630_v20  ;;  %v670_v34 = vmul.f32 0.125, %v642_v21 }
 0x1dd   :  { %v964_v35 = vadd.f32 %v963_v23, %v962_v1  ;;  %v976_v36 = vadd.f32 %v975_v24, %v974_v2  ;;  %v969_v37 = vrot.slane %v968_v25, 1  ;;  %v981_v38 = vrot.slane %v980_v27, 1 }
 0x1de   :  { %v683_v41 = vmul.f32 %v2555_v31, %v2555_v31  ;;  %v685_v42 = vmul.f32 %v2558_v32, %v2558_v32  ;;  %v2565_v22 = vsub.f32 %v2512_v14, %v668_v33  ;;  %v2568_v3 = vsub.f32 %v2514_v15, %v670_v34 }
 0x1df   :  { %v1007_v4 = vmul.f32 0.125, %v964_v35  ;;  %v1009_v43 = vmul.f32 0.125, %v976_v36  ;;  %v970_v44 = vadd.f32 %v969_v37, %v968_v25  ;;  %v982_v47 = vadd.f32 %v981_v38, %v980_v27 }
 0x1e0   :  { %v691_v48 = vrot.slane %v683_v41, 4  ;;  %v703_v49 = vrot.slane %v685_v42, 4  ;;  %v684_v50 = vmul.f32 %v2565_v22, %v2565_v22  ;;  %v686_v51 = vmul.f32 %v2568_v3, %v2568_v3 }
 0x1e1   :  { %v2575_v55 = vsub.f32 %v2532_v28, %v1007_v4  ;;  %v2578_v14 = vsub.f32 %v2534_v26, %v1009_v43  ;;  %v1008_v15 = vmul.f32 0.125, %v970_v44  ;;  %v1010_v56 = vmul.f32 0.125, %v982_v47 }
 0x1e2   :  { %v692_v57 = vadd.f32 %v691_v48, %v683_v41  ;;  %v704_v58 = vadd.f32 %v703_v49, %v685_v42  ;;  %v697_v59 = vrot.slane %v684_v50, 4  ;;  %v709_v60 = vrot.slane %v686_v51, 4  ;;  %v531_v48 = vpop.f32.mrf.mxu1 }
 0x1e3   :  { %v1023_v61 = vmul.f32 %v2575_v55, %v2575_v55  ;;  %v1025_v62 = vmul.f32 %v2578_v14, %v2578_v14  ;;  %v2585_v63 = vsub.f32 %v2544_v39, %v1008_v15  ;;  %v2588_v28 = vsub.f32 %v2546_v40, %v1010_v56  ;;  %v608_v56 = vpop.f32.mrf.mxu0 }
 0x1e4   :  { %v693_v26 = vrot.slane %v692_v57, 2  ;;  %v705_v0 = vrot.slane %v704_v58, 2  ;;  %v698_v1 = vadd.f32 %v697_v59, %v684_v50  ;;  %v710_v2 = vadd.f32 %v709_v60, %v686_v51 }
 0x1e5   :  { %v1031_v5 = vrot.slane %v1023_v61, 4  ;;  %v1043_v6 = vrot.slane %v1025_v62, 4  ;;  %v1024_v12 = vmul.f32 %v2585_v63, %v2585_v63  ;;  %v1026_v13 = vmul.f32 %v2588_v28, %v2588_v28 }
 0x1e6   :  { %v694_v20 = vadd.f32 %v693_v26, %v692_v57  ;;  %v706_v21 = vadd.f32 %v705_v0, %v704_v58  ;;  %v699_v23 = vrot.slane %v698_v1, 2  ;;  %v711_v39 = vrot.slane %v710_v2, 2 }
 0x1e7   :  { %v1032_v24 = vadd.f32 %v1031_v5, %v1023_v61  ;;  %v1044_v25 = vadd.f32 %v1043_v6, %v1025_v62  ;;  %v1037_v40 = vrot.slane %v1024_v12, 4  ;;  %v1049_v27 = vrot.slane %v1026_v13, 4 }
 0x1e8   :  { %v695_v33 = vrot.slane %v694_v20, 1  ;;  %v707_v34 = vrot.slane %v706_v21, 1  ;;  %v700_v35 = vadd.f32 %v699_v23, %v698_v1  ;;  %v712_v36 = vadd.f32 %v711_v39, %v710_v2  ;;  %v610_v39 = vpop.f32.mrf.mxu0 }
 0x1e9   :  { %v1033_v37 = vrot.slane %v1032_v24, 2  ;;  %v1045_v38 = vrot.slane %v1044_v25, 2  ;;  %v1038_v41 = vadd.f32 %v1037_v40, %v1024_v12  ;;  %v1050_v42 = vadd.f32 %v1049_v27, %v1026_v13  ;;  %v533_v12 = vpop.f32.mrf.mxu1 }
 0x1ea   :  { %v696_v4 = vadd.f32 %v695_v33, %v694_v20  ;;  %v708_v43 = vadd.f32 %v707_v34, %v706_v21  ;;  %v701_v44 = vrot.slane %v700_v35, 1  ;;  %v713_v47 = vrot.slane %v712_v36, 1 }
 0x1eb   :  { %v1034_v49 = vadd.f32 %v1033_v37, %v1032_v24  ;;  %v1046_v50 = vadd.f32 %v1045_v38, %v1044_v25  ;;  %v1039_v51 = vrot.slane %v1038_v41, 2  ;;  %v1051_v15 = vrot.slane %v1050_v42, 2  ;;  %v537_v38 = vpop.f32.mrf.mxu1 }
 0x1ec   :  { %v739_v57 = vmul.f32 0.125, %v696_v4  ;;  %v741_v58 = vmul.f32 0.125, %v708_v43  ;;  %v702_v59 = vadd.f32 %v701_v44, %v700_v35  ;;  %v714_v60 = vadd.f32 %v713_v47, %v712_v36  ;;  %v614_v43 = vpop.f32.mrf.mxu0 }
 0x1ed   :  { %v1035_v61 = vrot.slane %v1034_v49, 1  ;;  %v1047_v62 = vrot.slane %v1046_v50, 1  ;;  %v1040_v26 = vadd.f32 %v1039_v51, %v1038_v41  ;;  %v1052_v0 = vadd.f32 %v1051_v15, %v1050_v42 }
 0x1ee   :  { %v747_v1 = vadd.f32 1e-05, %v739_v57  ;;  %v749_v2 = vadd.f32 1e-05, %v741_v58  ;;  %v740_v5 = vmul.f32 0.125, %v702_v59  ;;  %v742_v6 = vmul.f32 0.125, %v714_v60  ;;  %v539_v59 = vpop.f32.mrf.mxu1 }
 0x1ef   :  { %v1036_v13 = vadd.f32 %v1035_v61, %v1034_v49  ;;  %v1048_v20 = vadd.f32 %v1047_v62, %v1046_v50  ;;  %v1041_v21 = vrot.slane %v1040_v26, 1  ;;  %v1053_v23 = vrot.slane %v1052_v0, 1 }
 0x1f0   :  { %1910 = vrsqrt.f32 %v747_v1  ;;  %v748_v24 = vadd.f32 1e-05, %v740_v5  ;;  %v750_v25 = vadd.f32 1e-05, %v742_v6  ;;  %v2595_v40 = vadd.f32 %v531_v48, %v2502_v7 }
 0x1f1   :  { %1912 = vrsqrt.f32 %v749_v2  ;;  %v1079_v27 = vmul.f32 0.125, %v1036_v13  ;;  %v1081_v33 = vmul.f32 0.125, %v1048_v20  ;;  %v1042_v34 = vadd.f32 %v1041_v21, %v1040_v26  ;;  %v616_v26 = vpop.f32.mrf.mxu0 }
 0x1f2   :  { %1914 = vrsqrt.f32 %v748_v24  ;;  %v1054_v35 = vadd.f32 %v1053_v23, %v1052_v0  ;;  %v643_v36 = vrot.slane %v2595_v40, 4  ;;  %v2599_v37 = vadd.f32 %v608_v56, %v2505_v10 }
 0x1f3   :  { %1916 = vrsqrt.f32 %v750_v25  ;;  %v1087_v41 = vadd.f32 1e-05, %v1079_v27  ;;  %v1089_v42 = vadd.f32 1e-05, %v1081_v33  ;;  %v1080_v4 = vmul.f32 0.125, %v1042_v34 }
 0x1f4   :  { %v1082_v44 = vmul.f32 0.125, %v1054_v35  ;;  %v644_v47 = vadd.f32 %v643_v36, %v2595_v40  ;;  %v655_v48 = vrot.slane %v2599_v37, 4  ;;  %v2604_v49 = vadd.f32 %v533_v12, %v2508_v11 }
 0x1f5   :  { %1918 = vrsqrt.f32 %v1087_v41  ;;  %v1088_v50 = vadd.f32 1e-05, %v1080_v4  ;;  %v2607_v51 = vadd.f32 %v610_v39, %v2517_v16  ;;  %v2610_v15 = vadd.f32 %v537_v38, %v2502_v7 }
 0x1f6   :  { %1920 = vrsqrt.f32 %v1089_v42  ;;  %v1090_v56 = vadd.f32 1e-05, %v1082_v44  ;;  %v645_v57 = vrot.slane %v644_v47, 2  ;;  %v656_v58 = vadd.f32 %v655_v48, %v2599_v37 }
 0x1f7   :  { %1922 = vrsqrt.f32 %v1088_v50  ;;  %v649_v60 = vrot.slane %v2604_v49, 4  ;;  %v661_v61 = vrot.slane %v2607_v51, 4  ;;  %v983_v62 = vrot.slane %v2610_v15, 4 }
 0x1f8   :  { %1924 = vrsqrt.f32 %v1090_v56  ;;  %v646_v0 = vadd.f32 %v645_v57, %v644_v47  ;;  %v657_v1 = vrot.slane %v656_v58, 2  ;;  %v2617_v7 = vadd.f32 %v614_v43, %v2505_v10 }
 0x1f9   :  { %v650_v2 = vadd.f32 %v649_v60, %v2604_v49  ;;  %v662_v5 = vadd.f32 %v661_v61, %v2607_v51  ;;  %v984_v6 = vadd.f32 %v983_v62, %v2610_v15  ;;  %v2623_v12 = vadd.f32 %v539_v59, %v2508_v11 }
 0x1fa   :  { %v647_v13 = vrot.slane %v646_v0, 1  ;;  %v658_v20 = vadd.f32 %v657_v1, %v656_v58  ;;  %v995_v21 = vrot.slane %v2617_v7, 4  ;;  %v2627_v23 = vadd.f32 %v616_v26, %v2517_v16 }
 0x1fb   :  { %v651_v39 = vrot.slane %v650_v2, 2  ;;  %v663_v24 = vrot.slane %v662_v5, 2  ;;  %v985_v10 = vrot.slane %v984_v6, 2  ;;  %v989_v25 = vrot.slane %v2623_v12, 4 }
 0x1fc   :  { %v648_v27 = vadd.f32 %v647_v13, %v646_v0  ;;  %v659_v33 = vrot.slane %v658_v20, 1  ;;  %v996_v34 = vadd.f32 %v995_v21, %v2617_v7  ;;  %v1001_v35 = vrot.slane %v2627_v23, 4 }
 0x1fd   :  { %v2632_v11 = vpop.eup %1910  ;;  %v652_v36 = vadd.f32 %v651_v39, %v650_v2  ;;  %v664_v38 = vadd.f32 %v663_v24, %v662_v5  ;;  %v986_v41 = vadd.f32 %v985_v10, %v984_v6  ;;  %v990_v42 = vadd.f32 %v989_v25, %v2623_v12 }
 0x1fe   :  { %v2635_v16 = vpop.eup %1912  ;;  %v671_v4 = vmul.f32 0.125, %v648_v27  ;;  %v660_v43 = vadd.f32 %v659_v33, %v658_v20  ;;  %v997_v44 = vrot.slane %v996_v34, 2  ;;  %v1002_v47 = vadd.f32 %v1001_v35, %v2627_v23 }
 0x1ff   :  { %v2638_v48 = vpop.eup %1914  ;;  %v653_v50 = vrot.slane %v652_v36, 1  ;;  %v665_v56 = vrot.slane %v664_v38, 1  ;;  %v987_v57 = vrot.slane %v986_v41, 1  ;;  %v991_v58 = vrot.slane %v990_v42, 2 }
 0x200   :  { %v2640_v59 = vpop.eup %1916  ;;  %v2643_v60 = vsub.f32 %v2595_v40, %v671_v4  ;;  %v673_v61 = vmul.f32 0.125, %v660_v43  ;;  %v998_v62 = vadd.f32 %v997_v44, %v996_v34  ;;  %v1003_v26 = vrot.slane %v1002_v47, 2 }
 0x201   :  { %v654_v0 = vadd.f32 %v653_v50, %v652_v36  ;;  %v666_v1 = vadd.f32 %v665_v56, %v664_v38  ;;  %v988_v2 = vadd.f32 %v987_v57, %v986_v41  ;;  %v992_v5 = vadd.f32 %v991_v58, %v990_v42 }
 0x202   :  { %v2645_v6 = vpop.eup %1918  ;;  %v687_v13 = vmul.f32 %v2643_v60, %v2643_v60  ;;  %v2650_v20 = vsub.f32 %v2599_v37, %v673_v61  ;;  %v999_v21 = vrot.slane %v998_v62, 1  ;;  %v1004_v39 = vadd.f32 %v1003_v26, %v1002_v47 }
 0x203   :  { %v2652_v24 = vpop.eup %1920  ;;  %v672_v40 = vmul.f32 0.125, %v654_v0  ;;  %v674_v10 = vmul.f32 0.125, %v666_v1  ;;  %v1011_v25 = vmul.f32 0.125, %v988_v2  ;;  %v993_v27 = vrot.slane %v992_v5, 1 }
 0x204   :  { %v2654_v33 = vpop.eup %1922  ;;  %v715_v34 = vrot.slane %v687_v13, 4  ;;  %v689_v35 = vmul.f32 %v2650_v20, %v2650_v20  ;;  %v1000_v36 = vadd.f32 %v999_v21, %v998_v62  ;;  %v1005_v38 = vrot.slane %v1004_v39, 1 }
 0x205   :  { %v2658_v41 = vpop.eup %1924  ;;  %v2661_v37 = vsub.f32 %v2604_v49, %v672_v40  ;;  %v2664_v42 = vsub.f32 %v2607_v51, %v674_v10  ;;  %v2667_v4 = vsub.f32 %v2610_v15, %v1011_v25  ;;  %v994_v43 = vadd.f32 %v993_v27, %v992_v5 }
 0x206   :  { %v716_v44 = vadd.f32 %v715_v34, %v687_v13  ;;  %v727_v47 = vrot.slane %v689_v35, 4  ;;  %v1013_v50 = vmul.f32 0.125, %v1000_v36  ;;  %v1006_v56 = vadd.f32 %v1005_v38, %v1004_v39 }
 0x207   :  { %3025 = vst [vmem:[#allocation12_spill] sm:$0xff] %v2667_v4  ;;  %v688_v57 = vmul.f32 %v2661_v37, %v2661_v37  ;;  %v690_v58 = vmul.f32 %v2664_v42, %v2664_v42  ;;  %v1027_v49 = vmul.f32 %v2667_v4, %v2667_v4  ;;  %v1012_v61 = vmul.f32 0.125, %v994_v43 }
 0x208   :  { %v717_v51 = vrot.slane %v716_v44, 2  ;;  %v728_v62 = vadd.f32 %v727_v47, %v689_v35  ;;  %v2676_v15 = vsub.f32 %v2617_v7, %v1013_v50  ;;  %v1014_v26 = vmul.f32 0.125, %v1006_v56 }
 0x209   :  { %v721_v0 = vrot.slane %v688_v57, 4  ;;  %v733_v1 = vrot.slane %v690_v58, 4  ;;  %v1055_v2 = vrot.slane %v1027_v49, 4  ;;  %v2679_v5 = vsub.f32 %v2623_v12, %v1012_v61 }
 0x20a   :  { %3026 = vst [vmem:[#allocation13_spill] sm:$0xff] %v2676_v15  ;;  %v718_v13 = vadd.f32 %v717_v51, %v716_v44  ;;  %v729_v21 = vrot.slane %v728_v62, 2  ;;  %v1029_v39 = vmul.f32 %v2676_v15, %v2676_v15  ;;  %v2684_v40 = vsub.f32 %v2627_v23, %v1014_v26 }
 0x20b   :  { %3027 = vst [vmem:[#allocation14_spill] sm:$0xff] %v2679_v5  ;;  %v722_v10 = vadd.f32 %v721_v0, %v688_v57  ;;  %v734_v25 = vadd.f32 %v733_v1, %v690_v58  ;;  %v1056_v27 = vadd.f32 %v1055_v2, %v1027_v49  ;;  %v1028_v7 = vmul.f32 %v2679_v5, %v2679_v5 }
 0x20c   :  { %3028 = vst [vmem:[#allocation15_spill] sm:$0xff] %v2684_v40  ;;  %v719_v34 = vrot.slane %v718_v13, 1  ;;  %v730_v35 = vadd.f32 %v729_v21, %v728_v62  ;;  %v1067_v36 = vrot.slane %v1029_v39, 4  ;;  %v1030_v12 = vmul.f32 %v2684_v40, %v2684_v40 }
 0x20d   :  { %v723_v38 = vrot.slane %v722_v10, 2  ;;  %v735_v43 = vrot.slane %v734_v25, 2  ;;  %v1057_v44 = vrot.slane %v1056_v27, 2  ;;  %v1061_v47 = vrot.slane %v1028_v7, 4 }
 0x20e   :  { %v720_v50 = vadd.f32 %v719_v34, %v718_v13  ;;  %v731_v56 = vrot.slane %v730_v35, 1  ;;  %v1068_v23 = vadd.f32 %v1067_v36, %v1029_v39  ;;  %v1073_v61 = vrot.slane %v1030_v12, 4 }
 0x20f   :  { %v724_v57 = vadd.f32 %v723_v38, %v722_v10  ;;  %v736_v58 = vadd.f32 %v735_v43, %v734_v25  ;;  %v1058_v49 = vadd.f32 %v1057_v44, %v1056_v27  ;;  %v1062_v51 = vadd.f32 %v1061_v47, %v1028_v7 }
 0x210   :  { %v743_v26 = vmul.f32 0.125, %v720_v50  ;;  %v732_v0 = vadd.f32 %v731_v56, %v730_v35  ;;  %v1069_v1 = vrot.slane %v1068_v23, 2  ;;  %v1074_v62 = vadd.f32 %v1073_v61, %v1030_v12 }
 0x211   :  { %v725_v2 = vrot.slane %v724_v57, 1  ;;  %v737_v21 = vrot.slane %v736_v58, 1  ;;  %v1059_v30 = vrot.slane %v1058_v49, 1  ;;  %v1063_v29 = vrot.slane %v1062_v51, 2 }
 0x212   :  { %v751_v15 = vadd.f32 1e-05, %v743_v26  ;;  %v745_v4 = vmul.f32 0.125, %v732_v0  ;;  %v1070_v40 = vadd.f32 %v1069_v1, %v1068_v23  ;;  %v1075_v5 = vrot.slane %v1074_v62, 2 }
 0x213   :  { %v726_v13 = vadd.f32 %v725_v2, %v724_v57  ;;  %v738_v34 = vadd.f32 %v737_v21, %v736_v58  ;;  %v1060_v39 = vadd.f32 %v1059_v30, %v1058_v49  ;;  %v1064_v36 = vadd.f32 %v1063_v29, %v1062_v51 }
 0x214   :  { %1926 = vrsqrt.f32 %v751_v15  ;;  %v753_v10 = vadd.f32 1e-05, %v745_v4  ;;  %v1071_v25 = vrot.slane %v1070_v40, 1  ;;  %v1076_v27 = vadd.f32 %v1075_v5, %v1074_v62 }
 0x215   :  { %v744_v7 = vmul.f32 0.125, %v726_v13  ;;  %v746_v35 = vmul.f32 0.125, %v738_v34  ;;  %v1083_v38 = vmul.f32 0.125, %v1060_v39  ;;  %v1065_v12 = vrot.slane %v1064_v36, 1 }
 0x216   :  { %1928 = vrsqrt.f32 %v753_v10  ;;  %v1072_v43 = vadd.f32 %v1071_v25, %v1070_v40  ;;  %v1077_v44 = vrot.slane %v1076_v27, 1  ;;  %v771_v47 = vcombine.low %v2632_v11, %v2638_v48 }
 0x217   :  { %v752_v50 = vadd.f32 1e-05, %v744_v7  ;;  %v754_v56 = vadd.f32 1e-05, %v746_v35  ;;  %v1091_v23 = vadd.f32 1e-05, %v1083_v38  ;;  %v1066_v61 = vadd.f32 %v1065_v12, %v1064_v36 }
 0x218   :  { %v1085_v30 = vmul.f32 0.125, %v1072_v43  ;;  %v1078_v29 = vadd.f32 %v1077_v44, %v1076_v27  ;;  %v775_v15 = vrot.slane %v771_v47, 7  ;;  %v772_v4 = vcombine.low %v2635_v16, %v2640_v59 }
 0x219   :  { %1930 = vrsqrt.f32 %v752_v50  ;;  %v1084_v5 = vmul.f32 0.125, %v1066_v61  ;;  %v1111_v57 = vcombine.low %v2645_v6, %v2654_v33  ;;  %v1112_v40 = vcombine.low %v2652_v24, %v2658_v41 }
 0x21a   :  { %1932 = vrsqrt.f32 %v754_v56  ;;  %v1086_v11 = vmul.f32 0.125, %v1078_v29  ;;  %v783_v48 = vmul.f32 %v775_v15, %v2456_v45  ;;  %v3029_v58 = vrot.slane %v2456_v45, %v2192_v9 }
 0x21b   :  { %v1093_v51 = vadd.f32 1e-05, %v1085_v30  ;;  %v1092_v26 = vadd.f32 1e-05, %v1084_v5  ;;  %v776_v16 = vrot.slane %v772_v4, 7  ;;  %v1115_v59 = vrot.slane %v1111_v57, 7 }
 0x21c   :  { %v914_v49 = vrot.slane %v3029_v58, %v2192_v9  ;;  %1934 = vrsqrt.f32 %v1091_v23  ;;  %v1094_v0 = vadd.f32 1e-05, %v1086_v11  ;;  %v794_v6 = vrot.slane %v783_v48, %v2189_v8  ;;  %v1321_v11 = vld [vmem:[%s3013_s4 + $0x2f0] sm:$0xff] }
 0x21d   :  { %v798_v33 = vrot.slane %v783_v48, %v2520_v17  ;;  %1936 = vrsqrt.f32 %v1092_v26  ;;  %v784_v24 = vmul.f32 %v776_v16, %v2461_v46  ;;  %v1123_v41 = vmul.f32 %v1115_v59, %v2456_v45  ;;  %v1305_v16 = vld [vmem:[%s3013_s4 + $0x270] sm:$0xff]  ;;  %v1338_v59 = vld [vmem:[%s3013_s4 + $0x378] sm:$0xff] }
 0x21e   :  { %v1116_v1 = vrot.slane %v1112_v40, 7  ;;  %1938 = vrsqrt.f32 %v1094_v0  ;;  %v834_v2 = vrot.slane %v794_v6, %v2189_v8  ;;  %v3030_v21 = vrot.slane %v2461_v46, %v2192_v9  ;;  %v1306_v40 = vld [vmem:[%s3013_s4 + $0x278] sm:$0xff] }
 0x21f   :  { %v838_v62 = vrot.slane %v798_v33, %v2189_v8  ;;  %v802_v34 = vrot.slane %v784_v24, %v2189_v8  ;;  %v806_v39 = vrot.slane %v784_v24, %v2520_v17  ;;  %v1138_v36 = vrot.slane %v1123_v41, %v2520_v17  ;;  %v1353_v33 = vld [vmem:[%s3013_s4 + $0x3f0] sm:$0xff] }
 0x220   :  { %v922_v13 = vrot.slane %v3030_v21, %v2192_v9  ;;  %v1124_v10 = vmul.f32 %v1116_v1, %v2461_v46  ;;  %1940 = vrsqrt.f32 %v1093_v51  ;;  %v863_v25 = vmul.f32 %v834_v2, %v2555_v31  ;;  %v1320_v1 = vld [vmem:[%s3013_s4 + $0x2e8] sm:$0xff] }
 0x221   :  { %v864_v45 = vmul.f32 %v838_v62, %v2565_v22  ;;  %v1134_v27 = vrot.slane %v1123_v41, %v2189_v8  ;;  %v1927_v7 = vpop.eup %1926  ;;  %v846_v35 = vrot.slane %v806_v39, %v2189_v8  ;;  %v842_v38 = vrot.slane %v802_v34, %v2189_v8  ;;  %v1352_v34 = vld [vmem:[%s3013_s4 + $0x3e8] sm:$0xff] }
 0x222   :  { %v1178_v12 = vrot.slane %v1138_v36, %v2189_v8  ;;  %v1146_v43 = vrot.slane %v1124_v10, %v2520_v17  ;;  %v943_v47 = vadd.f32 %v914_v49, %v863_v25  ;;  %v1142_v22 = vrot.slane %v1124_v10, %v2189_v8  ;;  %v1304_v36 = vld [vmem:[%s3013_s4 + $0x268] sm:$0xff] }
 0x223   :  { %v944_v44 = vadd.f32 %v2523_v18, %v864_v45  ;;  %v1174_v46 = vrot.slane %v1134_v27, %v2189_v8  ;;  %v1929_v50 = vpop.eup %1928  ;;  %v866_v31 = vmul.f32 %v846_v35, %v2568_v3  ;;  %v865_v56 = vmul.f32 %v842_v38, %v2558_v32  ;;  %v1319_v35 = vld [vmem:[%s3013_s4 + $0x2e0] sm:$0xff] }
 0x224   :  { %v1204_v23 = vmul.f32 %v1178_v12, %v2585_v63  ;;  %v1186_v61 = vrot.slane %v1146_v43, %v2189_v8  ;;  %v951_v29 = vmax.f32 %v943_v47, 0.0  ;;  %v1182_v4 = vrot.slane %v1142_v22, %v2189_v8  ;;  %v1351_v12 = vld [vmem:[%s3013_s4 + $0x3e0] sm:$0xff] }
 0x225   :  { %v952_v30 = vmax.f32 %v944_v44, 0.0  ;;  %v1203_v15 = vmul.f32 %v1174_v46, %v2575_v55  ;;  %v946_v5 = vadd.f32 %v2526_v19, %v866_v31  ;;  %v945_v57 = vadd.f32 %v922_v13, %v865_v56  ;;  %v1303_v43 = vld [vmem:[%s3013_s4 + $0x260] sm:$0xff]  ;;  %v1318_v46 = vld [vmem:[%s3013_s4 + $0x2d8] sm:$0xff] }
 0x226   :  { %v1212_v3 = vadd.f32 %v1204_v23, %v2523_v18  ;;  %v1206_v32 = vmul.f32 %v1186_v61, %v2588_v28  ;;  %v1931_v63 = vpop.eup %1930  ;;  %v1205_v48 = vmul.f32 %v1182_v4, %v2578_v14  ;;  %v894_v45 = vrot.slane %v2473_v52, %v2481_v54  ;;  %v1350_v23 = vld [vmem:[%s3013_s4 + $0x3d8] sm:$0xff]  ;;  %v1317_v4 = vld [vmem:[%s3013_s4 + $0x2d0] sm:$0xff] }
 0x227   :  { %1425 = vmatprep.mubr.f32.mxu1 %v952_v30  ;;  %v1211_v55 = vadd.f32 %v1203_v15, %v914_v49  ;;  %v1933_v58 = vpop.eup %1932  ;;  %v954_v51 = vmax.f32 %v946_v5, 0.0  ;;  %v953_v26 = vmax.f32 %v945_v57, 0.0  ;;  %v773_v49 = vcombine.low %v1927_v7, %v1931_v63  ;;  %v1336_v7 = vld [vmem:[%s3013_s4 + $0x368] sm:$0xff]  ;;  %v1302_v61 = vld [vmem:[%s3013_s4 + $0x258] sm:$0xff]  ;;  %v1349_v57 = vld [vmem:[%s3013_s4 + $0x3d0] sm:$0xff] }
 0x228   :  { %1426 = vmatmul.mubr.f32.vlgmr.msra.gmra.mxu1 %v951_v29  ;;  %v1220_v18 = vmax.f32 %v1212_v3, 0.0  ;;  %v1214_v28 = vadd.f32 %v1206_v32, %v2526_v19  ;;  %v1213_v0 = vadd.f32 %v1205_v48, %v922_v13  ;;  %v774_v6 = vcombine.low %v1929_v50, %v1933_v58  ;;  %v1337_v19 = vld [vmem:[%s3013_s4 + $0x370] sm:$0xff]  ;;  %v1334_v15 = vld [vmem:[%s3013_s4 + $0x358] sm:$0xff]  ;;  %v1348_v48 = vld [vmem:[%s3013_s4 + $0x3c8] sm:$0xff] }
 0x229   :  { %1815 = vmatpush3.msra.mxu1 %v1306_v40  ;;  %v1935_v14 = vpop.eup %1934  ;;  %1500 = vmatprep.mubr.f32.mxu0 %v954_v51  ;;  %v1219_v62 = vmax.f32 %v1211_v55, 0.0  ;;  %v777_v2 = vrot.slane %v773_v49, 7  ;;  %v902_v38 = vrot.slane %v2478_v53, %v2481_v54  ;;  %v1335_v54 = vld [vmem:[%s3013_s4 + $0x360] sm:$0xff]  ;;  %v2799_v56 = vrot.slane %v894_v45, %v2192_v9  ;;  %v1301_v40 = vld [vmem:[%s3013_s4 + $0x250] sm:$0xff]  ;;  %v1332_v51 = vld [vmem:[%s3013_s4 + $0x348] sm:$0xff] }
 0x22a   :  { %1816 = vmatprep.subr.mxu1 %v1321_v11  ;;  %v1222_v24 = vmax.f32 %v1214_v28, 0.0  ;;  %v1937_v41 = vpop.eup %1936  ;;  %1501 = vmatmul.mubr.f32.vlgmr.msra.gmra.mxu0 %v953_v26  ;;  %v778_v21 = vrot.slane %v774_v6, 7  ;;  %v1221_v39 = vmax.f32 %v1213_v0, 0.0  ;;  %v1333_v63 = vld [vmem:[%s3013_s4 + $0x350] sm:$0xff]  ;;  %v1299_v0 = vld [vmem:[%s3013_s4 + $0x240] sm:$0xff]  ;;  %v1314_v6 = vld [vmem:[%s3013_s4 + $0x2b8] sm:$0xff] }
 0x22b   :  { %1817 = vmatpush3.msra.mxu1 %v1305_v16  ;;  %v1939_v13 = vpop.eup %1938  ;;  %1853 = vmatpush3.msra.mxu0 %v1338_v59  ;;  %v2766_v10 = vmul.f32 %v777_v2, %v2473_v52  ;;  %v1113_v47 = vcombine.low %v1935_v14, %v1937_v41  ;;  %v2809_v29 = vrot.slane %v902_v38, %v2192_v9  ;;  %v1315_v16 = vld [vmem:[%s3013_s4 + $0x2c0] sm:$0xff]  ;;  %v1330_v41 = vld [vmem:[%s3013_s4 + $0x338] sm:$0xff]  ;;  %v1297_v2 = vld [vmem:[%s3013_s4 + $0x230] sm:$0xff] }
 0x22c   :  { %1430 = vmatprep.mubr.f32.mxu1 %v1220_v18  ;;  %1854 = vmatprep.subr.mxu0 %v1353_v33  ;;  %v2771_v25 = vmul.f32 %v778_v21, %v2478_v53  ;;  %v1347_v59 = vld [vmem:[%s3013_s4 + $0x3c0] sm:$0xff]  ;;  %v1298_v33 = vld [vmem:[%s3013_s4 + $0x238] sm:$0xff] }
 0x22d   :  { %1505 = vmatprep.mubr.f32.mxu0 %v1222_v24  ;;  %v1941_v27 = vpop.eup %1940  ;;  %1855 = vmatpush3.msra.mxu0 %v1337_v19  ;;  %v814_v44 = vrot.slane %v2766_v10, %v2520_v17  ;;  %v1117_v3 = vrot.slane %v1113_v47, 7  ;;  %v810_v14 = vrot.slane %v2766_v10, %v2189_v8  ;;  %v1313_v19 = vld [vmem:[%s3013_s4 + $0x2b0] sm:$0xff]  ;;  %v1296_v10 = vld [vmem:[%s3013_s4 + $0x228] sm:$0xff]  ;;  %v1311_v38 = vld [vmem:[%s3013_s4 + $0x2a0] sm:$0xff] }
 0x22e   :  { %1818 = vmatprep.subr.mxu1 %v1320_v1  ;;  %1856 = vmatprep.subr.mxu0 %v1352_v34  ;;  %v822_v22 = vrot.slane %v2771_v25, %v2520_v17  ;;  %v1114_v50 = vcombine.low %v1941_v27, %v1939_v13  ;;  %v818_v24 = vrot.slane %v2771_v25, %v2189_v8  ;;  %v1329_v13 = vld [vmem:[%s3013_s4 + $0x330] sm:$0xff]  ;;  %v1312_v34 = vld [vmem:[%s3013_s4 + $0x2a8] sm:$0xff]  ;;  %v1947_v25 = vld [vmem:[%s3015_s6 + $0x18] sm:$0x77] }
 0x22f   :  { %1431 = vmatmul.mubr.f32.gmra.mxu1 %v1219_v62  ;;  %1506 = vmatmul.mubr.f32.gmra.mxu0 %v1221_v39  ;;  %v854_v31 = vrot.slane %v814_v44, %v2189_v8  ;;  %v2846_v18 = vmul.f32 %v1117_v3, %v2473_v52  ;;  %v1331_v52 = vld [vmem:[%s3013_s4 + $0x340] sm:$0xff]  ;;  %v1345_v62 = vld [vmem:[%s3013_s4 + $0x3b0] sm:$0xff]  ;;  %v850_v45 = vrot.slane %v810_v14, %v2189_v8 }
 0x230   :  { %1819 = vmatpush3.msra.mxu1 %v1304_v36  ;;  %1857 = vmatpush3.msra.mxu0 %v1336_v7  ;;  %v862_v30 = vrot.slane %v822_v22, %v2189_v8  ;;  %v1118_v11 = vrot.slane %v1114_v50, 7  ;;  %v1946_v39 = vld [vmem:[%s3015_s6 + $0x10] sm:$0x77]  ;;  %v898_v27 = vrot.slane %v1947_v25, %v2192_v9  ;;  %v1343_v47 = vld [vmem:[%s3013_s4 + $0x3a0] sm:$0xff]  ;;  %v1310_v50 = vld [vmem:[%s3013_s4 + $0x298] sm:$0xff] }
 0x231   :  { %1820 = vmatprep.subr.mxu1 %v1319_v35  ;;  %1858 = vmatprep.subr.mxu0 %v1351_v12  ;;  %v868_v5 = vmul.f32 %v854_v31, %v2661_v37  ;;  %v1316_v37 = vld [vmem:[%s3013_s4 + $0x2c8] sm:$0xff]  ;;  %v1154_v1 = vrot.slane %v2846_v18, %v2520_v17  ;;  %v890_v36 = vrot.slane %v1946_v39, %v2192_v9  ;;  %v1327_v22 = vld [vmem:[%s3013_s4 + $0x320] sm:$0xff]  ;;  %v3031_v3 = vld [vmem:[#allocation14_spill] sm:$0xff] }
 0x232   :  { %1821 = vmatpush3.msra.mxu1 %v1303_v43  ;;  %1859 = vmatpush3.msra.mxu0 %v1335_v54  ;;  %v870_v32 = vmul.f32 %v862_v30, %v2664_v42  ;;  %v1300_v42 = vld [vmem:[%s3013_s4 + $0x248] sm:$0xff]  ;;  %v2855_v49 = vmul.f32 %v1118_v11, %v2478_v53  ;;  %v1346_v53 = vld [vmem:[%s3013_s4 + $0x3b8] sm:$0xff]  ;;  %v1150_v7 = vrot.slane %v2846_v18, %v2189_v8  ;;  %v1295_v54 = vld [vmem:[%s3013_s4 + $0x220] sm:$0xff] }
 0x233   :  { %1822 = vmatprep.subr.mxu1 %v1318_v46  ;;  %1860 = vmatprep.subr.mxu0 %v1350_v23  ;;  %v948_v55 = vadd.f32 %v2799_v56, %v868_v5  ;;  %v1328_v35 = vld [vmem:[%s3013_s4 + $0x328] sm:$0xff]  ;;  %v858_v12 = vrot.slane %v818_v24, %v2189_v8  ;;  %v1194_v43 = vrot.slane %v1154_v1, %v2189_v8  ;;  %v1342_v23 = vld [vmem:[%s3013_s4 + $0x398] sm:$0xff] }
 0x234   :  { %1823 = vmatpush3.msra.mxu1 %v1302_v61  ;;  %1861 = vmatpush3.msra.mxu0 %v1334_v15  ;;  %v950_v58 = vadd.f32 %v2809_v29, %v870_v32  ;;  %v1162_v21 = vrot.slane %v2855_v49, %v2520_v17  ;;  %v1344_v17 = vld [vmem:[%s3013_s4 + $0x3a8] sm:$0xff]  ;;  %v1158_v44 = vrot.slane %v2855_v49, %v2189_v8  ;;  %v1294_v61 = vld [vmem:[%s3013_s4 + $0x218] sm:$0xff]  ;;  %v1339_v49 = vld [vmem:[%s3013_s4 + $0x380] sm:$0xff] }
 0x235   :  { %1824 = vmatprep.subr.mxu1 %v1317_v4  ;;  %1862 = vmatprep.subr.mxu0 %v1349_v57  ;;  %v956_v26 = vmax.f32 %v948_v55, 0.0  ;;  %v930_v31 = vrot.slane %v890_v36, %v2192_v9  ;;  %v867_v30 = vmul.f32 %v850_v45, %v2643_v60  ;;  %v938_v15 = vrot.slane %v898_v27, %v2192_v9  ;;  %v1326_v5 = vld [vmem:[%s3013_s4 + $0x318] sm:$0xff]  ;;  %v1309_v57 = vld [vmem:[%s3013_s4 + $0x290] sm:$0xff]  ;;  %v1340_v55 = vld [vmem:[%s3013_s4 + $0x388] sm:$0xff] }
 0x236   :  { %1825 = vmatpush3.msra.mxu1 %v1301_v40  ;;  %1863 = vmatpush3.msra.mxu0 %v1333_v63  ;;  %v958_v28 = vmax.f32 %v950_v58, 0.0  ;;  %v1202_v46 = vrot.slane %v1162_v21, %v2189_v8  ;;  %v1190_v4 = vrot.slane %v1150_v7, %v2189_v8  ;;  %v869_v40 = vmul.f32 %v858_v12, %v2650_v20  ;;  %v1341_v9 = vld [vmem:[%s3013_s4 + $0x390] sm:$0xff]  ;;  %v3033_v58 = vld [vmem:[#allocation12_spill] sm:$0xff] }
 0x237   :  { %1826 = vmatprep.subr.mxu1 %v1316_v37  ;;  %1864 = vmatprep.subr.mxu0 %v1348_v48  ;;  %v1208_v32 = vmul.f32 %v1194_v43, %v3031_v3  ;;  %v1198_v60 = vrot.slane %v1158_v44, %v2189_v8  ;;  %v1293_v63 = vld [vmem:[%s3013_s4 + $0x210] sm:$0xff]  ;;  %v3032_v37 = vld [vmem:[#allocation15_spill] sm:$0xff]  ;;  %v1308_v8 = vld [vmem:[%s3013_s4 + $0x288] sm:$0xff] }
 0x238   :  { %1827 = vmatpush3.msra.mxu1 %v1300_v42  ;;  %1575 = vmatprep.mubr.f32.mxu1 %v956_v26  ;;  %v1210_v11 = vmul.f32 %v1202_v46, %v3032_v37  ;;  %v1325_v20 = vld [vmem:[%s3013_s4 + $0x310] sm:$0xff]  ;;  %v1292_v48 = vld [vmem:[%s3013_s4 + $0x208] sm:$0xff]  ;;  %v947_v42 = vadd.f32 %v930_v31, %v867_v30  ;;  %v949_v18 = vadd.f32 %v938_v15, %v869_v40 }
 0x239   :  { %1865 = vmatpush3.msra.mxu0 %v1332_v51  ;;  %1650 = vmatprep.mubr.f32.mxu0 %v958_v28  ;;  %v1207_v51 = vmul.f32 %v1190_v4, %v3033_v58  ;;  %v1324_v26 = vld [vmem:[%s3013_s4 + $0x308] sm:$0xff]  ;;  %v1216_v28 = vadd.f32 %v1208_v32, %v2799_v56  ;;  %v1323_v56 = vld [vmem:[%s3013_s4 + $0x300] sm:$0xff] }
 0x23a   :  { %1828 = vmatprep.subr.mxu1 %v1315_v16  ;;  %1866 = vmatprep.subr.mxu0 %v1347_v59  ;;  %v1307_v16 = vld [vmem:[%s3013_s4 + $0x280] sm:$0xff]  ;;  %v3034_v59 = vld [vmem:[#allocation13_spill] sm:$0xff]  ;;  %v955_v14 = vmax.f32 %v947_v42, 0.0 }
 0x23b   :  { %1829 = vmatpush3.msra.mxu1 %v1299_v0  ;;  %1867 = vmatpush3.msra.mxu0 %v1331_v52  ;;  %v1209_v0 = vmul.f32 %v1198_v60, %v3034_v59  ;;  %v1291_v52 = vld [vmem:[%s3013_s4 + $0x200] sm:$0xff]  ;;  %v1224_v24 = vmax.f32 %v1216_v28, 0.0  ;;  %s2035_s4 = smov [#allocation2]  }
 0x23c   :  { %1830 = vmatprep.subr.mxu1 %v1314_v6  ;;  %1868 = vmatprep.subr.mxu0 %v1346_v53  ;;  %v1218_v6 = vadd.f32 %v1210_v11, %v2809_v29  ;;  %v1215_v53 = vadd.f32 %v1207_v51, %v930_v31  ;;  %s1672_s28 = sshll.u32 %s2035_s4, 4  ;;  %s1673_s28 = int_to_ptr.vmem [resolvable:$true] %s1672_s28 }
 0x23d   :  { %1831 = vmatpush3.msra.mxu1 %v1298_v33  ;;  %1869 = vmatpush3.msra.mxu0 %v1330_v41  ;;  %v957_v33 = vmax.f32 %v949_v18, 0.0  ;;  %v1217_v41 = vadd.f32 %v1209_v0, %v938_v15  ;;  %s1948_s0 = scalar_lea.vmem %s1673_s28, 128  ;;  %p1953_p1 = scmp.lt.s32.totalorder %s1673_s28, %s1673_s28 }
 0x23e   :  { %1832 = vmatprep.subr.mxu1 %v1313_v19  ;;  %1870 = vmatprep.subr.mxu0 %v1345_v62  ;;  %v1226_v19 = vmax.f32 %v1218_v6, 0.0  ;;  %v1223_v29 = vmax.f32 %v1215_v53, 0.0  ;;  %p1949_p0 = scmp.ne.s32.totalorder %s1673_s28, %s1948_s0  ;;  %p1954_p2 = scmp.lt.s32.totalorder %s1948_s0, %s1948_s0 }
 0x23f   :  { %1833 = vmatpush3.msra.mxu1 %v1297_v2  ;;  %1871 = vmatpush3.msra.mxu0 %v1329_v13  ;;  %v1225_v1 = vmax.f32 %v1217_v41, 0.0 }
 0x240   :  { %1834 = vmatprep.subr.mxu1 %v1312_v34  ;;  %1872 = vmatprep.subr.mxu0 %v1344_v17  ;;  %p1955_p3 = por %p1954_p2, %p1953_p1 }
 0x241   :  { %1835 = vmatpush3.msra.mxu1 %v1296_v10  ;;  %1873 = vmatpush3.msra.mxu0 %v1328_v35 }
 0x242   :  { %1836 = vmatprep.subr.mxu1 %v1311_v38  ;;  %1874 = vmatprep.subr.mxu0 %v1343_v47  ;;  %p1956_p4 = pnand %p1955_p3, %p1949_p0 }
 0x243   :  { %1837 = vmatpush3.msra.mxu1 %v1295_v54  ;;  %1875 = vmatpush3.msra.mxu0 %v1327_v22 }
 0x244   :  { %1838 = vmatprep.subr.mxu1 %v1310_v50  ;;  %1876 = vmatprep.subr.mxu0 %v1342_v23 }
 0x245   :  { %1839 = vmatpush3.msra.mxu1 %v1294_v61  ;;  %1877 = vmatpush3.msra.mxu0 %v1326_v5 }
 0x246   :  { %1840 = vmatprep.subr.mxu1 %v1309_v57  ;;  %1878 = vmatprep.subr.mxu0 %v1341_v9 }
 0x247   :  { %1841 = vmatpush3.msra.mxu1 %v1293_v63  ;;  %1879 = vmatpush3.msra.mxu0 %v1325_v20 }
 0x248   :  { %1842 = vmatprep.subr.mxu1 %v1308_v8  ;;  %1880 = vmatprep.subr.mxu0 %v1340_v55 }
 0x249   :  { %1843 = vmatpush3.msra.mxu1 %v1292_v48  ;;  %1881 = vmatpush3.msra.mxu0 %v1324_v26 }
 0x24a   :  { %1844 = vmatprep.subr.mxu1 %v1307_v16  ;;  %1882 = vmatprep.subr.mxu0 %v1339_v49 }
 0x24b   :  { %1845 = vmatpush3.msra.mxu1 %v1291_v52  ;;  %1883 = vmatpush3.msra.mxu0 %v1323_v56 }
 0x24c   :  { %1576 = vmatmul.mubr.f32.vlgmr.msra.gmra.mxu1 %v955_v14  ;;  %1651 = vmatmul.mubr.f32.vlgmr.msra.gmra.mxu0 %v957_v33 }
 0x24d   :  { %1580 = vmatprep.mubr.f32.mxu1 %v1224_v24  ;;  %1655 = vmatprep.mubr.f32.mxu0 %v1226_v19 }
 0x250   :  { %1581 = vmatmul.mubr.f32.gmra.mxu1 %v1223_v29  ;;  %1656 = vmatmul.mubr.f32.gmra.mxu0 %v1225_v1 }
 0x251   :  { %1959 = shalt.err (!%p1956_p4)
}
 0x252   :  { %1675 = dma.vmem_to_hbm [thread:$0]  %s1673_s28, 128, %s3017_s8, [#allocation3]   ;;  %v1731_v17 = vld [vmem:[%s3016_s7] ss:$0 sm:$0xff]  ;;  %vm1663_vm1 = vcmask 130048  }
 0x253   :  { %s2036_s7 = smov [#allocation4]   ;;  %s2037_s13 = smov [#allocation6]  }
 0x254   :  { %s1682_s8 = sshll.u32 %s2036_s7, 4  ;;  %s1692_s14 = sshll.u32 %s2037_s13, 4  ;;  %s1683_s8 = int_to_ptr.vmem [resolvable:$true] %s1682_s8  ;;  %s1693_s14 = int_to_ptr.vmem [resolvable:$true] %s1692_s14 }
 0x255   :  { %s2038_s1 = smov [#allocation7]   ;;  %s1968_s16 = scalar_lea.vmem %s1683_s8, 128 }
 0x256   :  { %s1702_s15 = sshll.u32 %s2038_s1, 4  ;;  %p1969_p5 = scmp.ne.s32.totalorder %s1683_s8, %s1968_s16  ;;  %s1703_s15 = int_to_ptr.vmem [resolvable:$true] %s1702_s15 }
 0x257   :  { %p1973_p6 = scmp.lt.s32.totalorder %s1683_s8, %s1683_s8  ;;  %p1974_p7 = scmp.lt.s32.totalorder %s1968_s16, %s1968_s16 }
 0x259   :  { %p1975_p8 = por %p1974_p7, %p1973_p6 }
 0x25b   :  { %p1976_p9 = pnand %p1975_p8, %p1969_p5 }
 0x2e8   :  { %v1770_v62 = vpop.f32.mrf.mxu1 }
 0x2ea   :  { %v1808_v2 = vpop.f32.mrf.mxu0  ;;  %v1771_v21 = vpop.f32.mrf.mxu1 }
 0x2eb   :  { %v1772_v39 = vadd.f32 %v1771_v21, %v1770_v62 }
 0x2ec   :  { %v1809_v13 = vpop.f32.mrf.mxu0 }
 0x2ed   :  { %v1428_v45 = vadd.f32 %v1772_v39, %v1731_v17  ;;  %v1810_v35 = vadd.f32 %v1809_v13, %v1808_v2 }
 0x2ef   :  { %v1773_v34 = vpop.f32.mrf.mxu1  ;;  %v1811_v36 = vpop.f32.mrf.mxu0  ;;  %v1503_v43 = vadd.f32 %v1810_v35, %v1428_v45 }
 0x2f1   :  { %v1774_v10 = vpop.f32.mrf.mxu1  ;;  %v1812_v27 = vpop.f32.mrf.mxu0 }
 0x2f2   :  { %v1775_v25 = vadd.f32 %v1774_v10, %v1773_v34  ;;  %v1813_v22 = vadd.f32 %v1812_v27, %v1811_v36 }
 0x2f4   :  { %v1433_v44 = vadd.f32 %v1775_v25, %v1731_v17 }
 0x2f6   :  { %v1508_v30 = vadd.f32 %v1813_v22, %v1433_v44 }
 0x30c   :  { %v1846_v7 = vpop.f32.mrf.mxu1  ;;  %v1884_v38 = vpop.f32.mrf.mxu0 }
 0x30e   :  { %v1847_v12 = vpop.f32.mrf.mxu1  ;;  %v1885_v54 = vpop.f32.mrf.mxu0 }
 0x30f   :  { %v1848_v47 = vadd.f32 %v1847_v12, %v1846_v7  ;;  %v1886_v31 = vadd.f32 %v1885_v54, %v1884_v38 }
 0x310   :  { %v1849_v46 = vpop.f32.mrf.mxu1  ;;  %v1887_v23 = vpop.f32.mrf.mxu0 }
 0x311   :  { %v1578_v50 = vadd.f32 %v1848_v47, %v1503_v43 }
 0x312   :  { %v1850_v61 = vpop.f32.mrf.mxu1  ;;  %v1888_v5 = vpop.f32.mrf.mxu0 }
 0x313   :  { %v1653_v15 = vadd.f32 %v1886_v31, %v1578_v50  ;;  %v1851_v4 = vadd.f32 %v1850_v61, %v1849_v46  ;;  %v1889_v40 = vadd.f32 %v1888_v5, %v1887_v23 }
 0x315   :  { %1942 = vtanh.f32 %v1653_v15  ;;  %v1583_v57 = vadd.f32 %v1851_v4, %v1508_v30 }
 0x317   :  { %v1658_v3 = vadd.f32 %v1889_v40, %v1583_v57 }
 0x319   :  { %1944 = vtanh.f32 %v1658_v3 }
 0x322   :  { %v1943_v32 = vpop.eup %1942 }
 0x323   :  { %1664 = vst.msk [vmem:[#allocation4] sm:$0xff] %vm1663_vm1, %v1943_v32 }
 0x324   :  { %1979 = shalt.err (!%p1976_p9)
}
 0x325   :  { %1685 = dma.vmem_to_hbm [thread:$0]  %s1683_s8, 128, %s3018_s9, [#allocation5]  }
 0x326   :  { %s1988_s18 = scalar_lea.vmem %s1693_s14, 128  ;;  %p1993_p11 = scmp.lt.s32.totalorder %s1693_s14, %s1693_s14 }
 0x327   :  { %p1989_p10 = scmp.ne.s32.totalorder %s1693_s14, %s1988_s18  ;;  %p1994_p12 = scmp.lt.s32.totalorder %s1988_s18, %s1988_s18 }
 0x329   :  { %p1995_p13 = por %p1994_p12, %p1993_p11 }
 0x32b   :  { %p1996_p0 = pnand %p1995_p13, %p1989_p10 }
 0x32d   :  { %1999 = shalt.err (!%p1996_p0)
}
 0x32e   :  { %1695 = dma.vmem_to_hbm [thread:$0]  %s1693_s14, 128, %s3019_s10, [#allocation5]   ;;  %v1945_v60 = vpop.eup %1944 }
 0x32f   :  { %1665 = vst.msk [vmem:[#allocation7] sm:$0xff] %vm1663_vm1, %v1945_v60  ;;  %s2008_s21 = scalar_lea.vmem %s1703_s15, 128  ;;  %p2013_p2 = scmp.lt.s32.totalorder %s1703_s15, %s1703_s15 }
 0x330   :  { %p2009_p1 = scmp.ne.s32.totalorder %s1703_s15, %s2008_s21  ;;  %p2014_p3 = scmp.lt.s32.totalorder %s2008_s21, %s2008_s21 }
 0x332   :  { %p2015_p4 = por %p2014_p3, %p2013_p2 }
 0x334   :  { %p2016_p5 = pnand %p2015_p4, %p2009_p1 }
 0x336   :  { %2019 = shalt.err (!%p2016_p5)
}
 0x337   :  { %1705 = dma.vmem_to_hbm [thread:$0]  %s1703_s15, 128, %s3020_s11, [#allocation8]  }
 0x338   :  { %2028 = dma.done.wait [#allocation3], 128  }
 0x339   :  { %2029 = vsyncadd [#allocation3], 4294967168 }
 0x33a   :  { %2030 = dma.done.wait [#allocation5], 256  }
 0x33b   :  { %2031 = vsyncadd [#allocation5], 4294967040 }
 0x33c   :  { %2032 = dma.done.wait [#allocation8], 128  }
 0x33d   :  { %2033 = vsyncadd [#allocation8], 4294967168 }
 0x33e   :  { %1718 = vsyncpa [#allocation3], 1 }
 0x33f   :  { %1719 = vsyncpa [#allocation5], 1 }
 0x340   :  { %1720 = vsyncpa [#allocation8], 1 }

</bundles_post_ra>
